<compile_context>
chip_gen: v5e
topology: v5e:2x2
jax: 0.10.0
libtpu: 0.0.40
codegen_flags: <defaults>
</compile_context>

<pallas_src>
import functools

import numpy as np

import jax
import jax.numpy as jnp
from jax import lax
from jax.experimental import pallas as pl
from jax.experimental.pallas import tpu as pltpu


# ----------------------------------------------------------------------------
# Fused kernel:  y = conv2d(x * in_scale + in_shift)   ('same', stride=1)
#                + per-image partial BN statistics of y (sum, sum of squares).
# Layout inside the kernel: channels on sublanes, flattened spatial (H*W) on
# lanes, so the accumulator, MXU N dimension and the output store are all
# lane-dense.
# ----------------------------------------------------------------------------
def _conv_bn_stats_kernel(x_ref, w_ref, mask_ref, sc_ref, sh_ref,
                          y_ref, psum_ref, psumsq_ref, dbl_ref,
                          *, H, W, K, P, Cin, Cout):
    S = H * W

    # BN prologue: per-input-channel affine (identity for conv1, bn1's
    # scale/shift for conv2).  It is applied to real pixels only; the conv's
    # implicit zero padding is reproduced exactly by the border masks below.
    z = x_ref[0].astype(jnp.float32) * sc_ref[...] + sh_ref[...]        # (Cin, S)

    # Write z twice into a doubled VMEM buffer so that every spatially shifted
    # window of the flattened image is a single contiguous static slice
    # (no relayout/reshape, no padded copy in HBM).
    dbl_ref[:, 0:S] = z
    dbl_ref[:, S:2 * S] = z

    # K*K shifted-window matmuls accumulated in registers: (Cout, H*W).
    acc = jnp.zeros((Cout, S), jnp.float32)
    for kh in range(K):
        for kw in range(K):
            t = kh * K + kw
            d = (kh - P) * W + (kw - P)          # flat spatial shift of this tap
            if d == 0:
                tap = z                           # centre tap: no shift, no mask
            else:
                # window [k, k+S) of [z, z] == z shifted by d; entries that
                # wrapped across image/row borders are zeroed by the mask.
                k = d % S
                tap = dbl_ref[:, k:k + S] * mask_ref[t]                  # (Cin, S)
            acc = acc + jnp.dot(w_ref[t], tap,                           # (Cout, Cin)@(Cin, S)
                                preferred_element_type=jnp.float32)

    # NOTE: conv bias intentionally dropped -- cancelled exactly by the
    # batch-mean subtraction of the following training-mode BatchNorm.
    y_ref[0] = acc.astype(y_ref.dtype)

    # Per-image partial BN statistics (fused: no extra pass over y in HBM).
    psum_ref[0] = jnp.sum(acc, axis=1, keepdims=True)                    # (Cout, 1)
    psumsq_ref[0] = jnp.sum(acc * acc, axis=1, keepdims=True)            # (Cout, 1)


def _conv_bn_stats(x_ncs, w_taps, border_mask, in_scale, in_shift, *, H, W, K, P):
    """Returns (y, partial_sum, partial_sumsq); activations are (N, C, H*W)."""
    N, Cin, S = x_ncs.shape
    Cout = w_taps.shape[1]
    assert S == H * W and w_taps.shape == (K * K, Cout, Cin)
    assert 2 * P == K - 1, "only 'same' convs implemented"   # TODO(synk): general geometry

    kernel = functools.partial(_conv_bn_stats_kernel,
                               H=H, W=W, K=K, P=P, Cin=Cin, Cout=Cout)
    return pl.pallas_call(
        kernel,
        out_shape=(
            jax.ShapeDtypeStruct((N, Cout, S), x_ncs.dtype),
            jax.ShapeDtypeStruct((N, Cout, 1), jnp.float32),
            jax.ShapeDtypeStruct((N, Cout, 1), jnp.float32),
        ),
        grid=(N,),
        in_specs=[
            pl.BlockSpec((1, Cin, S), lambda n: (n, 0, 0)),
            pl.BlockSpec((K * K, Cout, Cin), lambda n: (0, 0, 0)),
            pl.BlockSpec((K * K, 1, S), lambda n: (0, 0, 0)),
            pl.BlockSpec((Cin, 1), lambda n: (0, 0)),
            pl.BlockSpec((Cin, 1), lambda n: (0, 0)),
        ],
        out_specs=(
            pl.BlockSpec((1, Cout, S), lambda n: (n, 0, 0)),
            pl.BlockSpec((1, Cout, 1), lambda n: (n, 0, 0)),
            pl.BlockSpec((1, Cout, 1), lambda n: (n, 0, 0)),
        ),
        scratch_shapes=[pltpu.VMEM((Cin, 2 * S), jnp.float32)],
        compiler_params=pltpu.CompilerParams(
            dimension_semantics=("parallel",),       # batch axis (both cores on v7x)
            vmem_limit_bytes=32 * 1024 * 1024,       # explicit budget (tiles are tiny here)
        ),
    )(x_ncs, w_taps, border_mask, in_scale, in_shift)


# ----------------------------------------------------------------------------
# bn2 + ReLU epilogue: single lane-dense pass over the conv2 output.
# ----------------------------------------------------------------------------
def _bn_relu_kernel(x_ref, sc_ref, sh_ref, o_ref):
    y = x_ref[0].astype(jnp.float32) * sc_ref[...] + sh_ref[...]
    o_ref[0] = jnp.maximum(y, 0.0).astype(o_ref.dtype)


def _bn_relu(x_ncs, scale, shift):
    N, C, S = x_ncs.shape
    return pl.pallas_call(
        _bn_relu_kernel,
        out_shape=jax.ShapeDtypeStruct((N, C, S), x_ncs.dtype),
        grid=(N,),
        in_specs=[
            pl.BlockSpec((1, C, S), lambda n: (n, 0, 0)),
            pl.BlockSpec((C, 1), lambda n: (0, 0)),
            pl.BlockSpec((C, 1), lambda n: (0, 0)),
        ],
        out_specs=pl.BlockSpec((1, C, S), lambda n: (n, 0, 0)),
        compiler_params=pltpu.CompilerParams(
            dimension_semantics=("parallel",),
            vmem_limit_bytes=32 * 1024 * 1024,
        ),
    )(x_ncs, scale, shift)


# ----------------------------------------------------------------------------
# Small JAX glue: finish BN statistics, build per-tap border masks.
# ----------------------------------------------------------------------------
def _bn_affine_from_partials(psum, psumsq, gamma, beta, count, eps):
    total = jnp.sum(psum, axis=0)[:, 0]          # (C,)
    total_sq = jnp.sum(psumsq, axis=0)[:, 0]     # (C,)
    mean = total / count
    # Biased variance (BatchNorm forward).  E[x^2]-mean^2 form is fine at these
    # magnitudes (see review note on cancellation).
    var = total_sq / count - mean * mean
    inv = gamma / jnp.sqrt(var + eps)
    scale = inv
    shift = beta - mean * inv
    return (scale.reshape(-1, 1).astype(jnp.float32),
            shift.reshape(-1, 1).astype(jnp.float32))


def _border_masks(H, W, K, P):
    """(K*K, 1, H*W) 0/1 masks: valid taps of a 'same' conv at each pixel."""
    S = H * W
    m = np.zeros((K * K, 1, S), np.float32)
    for kh in range(K):
        for kw in range(K):
            dh, dw = kh - P, kw - P
            valid = np.zeros((H, W), np.float32)
            valid[max(0, -dh):min(H, H - dh), max(0, -dw):min(W, W - dw)] = 1.0
            m[kh * K + kw, 0] = valid.reshape(S)
    return jnp.asarray(m)


# ----------------------------------------------------------------------------
# Full block forward (NCHW in / NCHW out, like the PyTorch module).
# ----------------------------------------------------------------------------
def convolution_block_forward(x_nchw, params, *, eps=1e-5):
    """relu(bn2(conv2(bn1(conv1(x))))) with training-mode (batch) BN statistics."""
    N, Cin, H, W = x_nchw.shape
    Cout, _, K, _ = params["w1"].shape
    P = 1                                   # module default padding ('same')
    S = H * W

    # NCHW with flattened spatial: free layout change, lane-dense Pallas I/O.
    x = x_nchw.reshape(N, Cin, S).astype(jnp.float32)

    # PyTorch OIHW weights -> (K*K, Cout, Cin) per-tap matrices.
    w1_t = jnp.transpose(params["w1"], (2, 3, 0, 1)).reshape(K * K, Cout, Cin)
    w2_t = jnp.transpose(params["w2"], (2, 3, 0, 1)).reshape(K * K, Cout, Cout)
    masks = _border_masks(H, W, K, P)
    count = float(N * S)

    # conv1 (+ fused y1 batch statistics).  Biases b1/b2 are dropped: they are
    # cancelled exactly by the following batch-statistics BatchNorms.
    one = jnp.ones((Cin, 1), jnp.float32)
    zero = jnp.zeros((Cin, 1), jnp.float32)
    y1, ps1, pss1 = _conv_bn_stats(x, w1_t.astype(jnp.float32), masks, one, zero,
                                   H=H, W=W, K=K, P=P)
    s1, t1 = _bn_affine_from_partials(ps1, pss1, params["g1"], params["be1"], count, eps)

    # conv2 with bn1 folded in as its input prologue (+ fused y2 statistics).
    y2, ps2, pss2 = _conv_bn_stats(y1, w2_t.astype(jnp.float32), masks, s1, t1,
                                   H=H, W=W, K=K, P=P)
    s2, t2 = _bn_affine_from_partials(ps2, pss2, params["g2"], params["be2"], count, eps)

    # bn2 + ReLU in one lane-dense epilogue pass.
    out = _bn_relu(y2, s2, t2)
    return out.reshape(N, Cout, H, W)


# Pure-JAX reference (exact PyTorch semantics, including conv biases).
def _reference(x_nchw, p, eps=1e-5):
    def conv(x, w, b):
        y = lax.conv_general_dilated(
            x, w, window_strides=(1, 1), padding=((1, 1), (1, 1)),
            dimension_numbers=("NCHW", "OIHW", "NCHW"))
        return y + b.reshape(1, -1, 1, 1)

    def bn(x, g, b):
        m = jnp.mean(x, axis=(0, 2, 3), keepdims=True)
        v = jnp.var(x, axis=(0, 2, 3), keepdims=True)    # biased variance
        return (x - m) / jnp.sqrt(v + eps) * g.reshape(1, -1, 1, 1) + b.reshape(1, -1, 1, 1)

    y = bn(conv(x_nchw, p["w1"], p["b1"]), p["g1"], p["be1"])
    y = bn(conv(y, p["w2"], p["b2"]), p["g2"], p["be2"])
    return jnp.maximum(y, 0.0)


if __name__ == "__main__":
    key = jax.random.PRNGKey(0)
    in_c, out_c, K = 4, 8, 3
    N, H, W = 2, 16, 16

    k0, k1, k2, k3, k4 = jax.random.split(key, 5)
    params = {
        # PyTorch-layout parameters: Conv2d weight (out, in, K, K) + bias,
        # BatchNorm2d weight/bias (default init: weight=1, bias=0).
        "w1": jax.random.normal(k0, (out_c, in_c, K, K), jnp.float32) * 0.1,
        "b1": jax.random.normal(k1, (out_c,), jnp.float32) * 0.1,
        "w2": jax.random.normal(k2, (out_c, out_c, K, K), jnp.float32) * 0.1,
        "b2": jax.random.normal(k3, (out_c,), jnp.float32) * 0.1,
        "g1": jnp.ones((out_c,), jnp.float32),
        "be1": jnp.zeros((out_c,), jnp.float32),
        "g2": jnp.ones((out_c,), jnp.float32),
        "be2": jnp.zeros((out_c,), jnp.float32),
    }
    x = jax.random.normal(k4, (N, in_c, H, W), jnp.float32)

    out = jax.block_until_ready(jax.jit(convolution_block_forward)(x, params))
    ref = _reference(x, params)

    assert out.shape == (N, out_c, H, W)
    err = float(jnp.max(jnp.abs(out - ref)))
    assert jnp.allclose(out, ref, atol=1e-4, rtol=1e-4), f"max abs err = {err}"
    print("KERNEL_OK")
</pallas_src>

<mosaic_0001>
module attributes {stable_mosaic.version = 11 : i64} {
  func.func @_conv_bn_stats_kernel(%arg0: i32, %arg1: memref<1x4x256xf32, #tpu.memory_space<vmem>>, %arg2: memref<9x8x4xf32, #tpu.memory_space<vmem>>, %arg3: memref<9x1x256xf32, #tpu.memory_space<vmem>>, %arg4: memref<4x1xf32, #tpu.memory_space<vmem>>, %arg5: memref<4x1xf32, #tpu.memory_space<vmem>>, %arg6: memref<1x8x256xf32, #tpu.memory_space<vmem>>, %arg7: memref<1x8x1xf32, #tpu.memory_space<vmem>>, %arg8: memref<1x8x1xf32, #tpu.memory_space<vmem>>, %arg9: memref<4x512xf32, #tpu.memory_space<vmem>>) attributes {dimension_semantics = [#tpu.dimension_semantics<parallel>], iteration_bounds = array<i64: 2>, scalar_prefetch = 0 : i64, scratch_operands = 1 : i64, tpu.core_type = #tpu.core_type<tc>, window_params = [{transform_indices = @transform_0, window_bounds = array<i64: 1, 4, 256>}, {pipeline_mode = #tpu.pipeline_mode<synchronous>, transform_indices = @transform_1, window_bounds = array<i64: 9, 8, 4>}, {pipeline_mode = #tpu.pipeline_mode<synchronous>, transform_indices = @transform_2, window_bounds = array<i64: 9, 1, 256>}, {pipeline_mode = #tpu.pipeline_mode<synchronous>, transform_indices = @transform_3, window_bounds = array<i64: 4, 1>}, {pipeline_mode = #tpu.pipeline_mode<synchronous>, transform_indices = @transform_4, window_bounds = array<i64: 4, 1>}, {transform_indices = @transform_5, window_bounds = array<i64: 1, 8, 256>}, {transform_indices = @transform_6, window_bounds = array<i64: 1, 8, 1>}, {transform_indices = @transform_7, window_bounds = array<i64: 1, 8, 1>}]} {
    %c0 = arith.constant 0 : index
    %c0_0 = arith.constant 0 : index
    %c0_1 = arith.constant 0 : index
    %0 = vector.load %arg1[%c0, %c0_0, %c0_1] : memref<1x4x256xf32, #tpu.memory_space<vmem>>, vector<1x4x256xf32>
    %1 = vector.shape_cast %0 : vector<1x4x256xf32> to vector<4x256xf32>
    %c0_2 = arith.constant 0 : index
    %c0_3 = arith.constant 0 : index
    %2 = vector.load %arg4[%c0_2, %c0_3] : memref<4x1xf32, #tpu.memory_space<vmem>>, vector<4x1xf32>
    %3 = vector.broadcast %2 : vector<4x1xf32> to vector<4x256xf32>
    %4 = arith.mulf %1, %3 : vector<4x256xf32>
    %c0_4 = arith.constant 0 : index
    %c0_5 = arith.constant 0 : index
    %5 = vector.load %arg5[%c0_4, %c0_5] : memref<4x1xf32, #tpu.memory_space<vmem>>, vector<4x1xf32>
    %6 = vector.broadcast %5 : vector<4x1xf32> to vector<4x256xf32>
    %7 = arith.addf %4, %6 : vector<4x256xf32>
    %c0_6 = arith.constant 0 : index
    %c0_7 = arith.constant 0 : index
    %8 = vector.load %arg9[%c0_6, %c0_7] : memref<4x512xf32, #tpu.memory_space<vmem>>, vector<4x256xf32>
    tpu.vector_store %arg9[%c0_6, %c0_7], %7 {strides = array<i32>} : memref<4x512xf32, #tpu.memory_space<vmem>>, vector<4x256xf32>,
    %c0_8 = arith.constant 0 : index
    %c256 = arith.constant 256 : index
    %9 = vector.load %arg9[%c0_8, %c256] : memref<4x512xf32, #tpu.memory_space<vmem>>, vector<4x256xf32>
    tpu.vector_store %arg9[%c0_8, %c256], %7 {strides = array<i32>} : memref<4x512xf32, #tpu.memory_space<vmem>>, vector<4x256xf32>,
    %cst = arith.constant 0.000000e+00 : f32
    %10 = vector.broadcast %cst : f32 to vector<8x256xf32>
    %c0_9 = arith.constant 0 : index
    %c239 = arith.constant 239 : index
    %11 = vector.load %arg9[%c0_9, %c239] : memref<4x512xf32, #tpu.memory_space<vmem>>, vector<4x256xf32>
    %c0_10 = arith.constant 0 : index
    %c0_11 = arith.constant 0 : index
    %c0_12 = arith.constant 0 : index
    %12 = vector.load %arg3[%c0_10, %c0_11, %c0_12] : memref<9x1x256xf32, #tpu.memory_space<vmem>>, vector<1x1x256xf32>
    %13 = vector.shape_cast %12 : vector<1x1x256xf32> to vector<1x256xf32>
    %14 = vector.broadcast %13 : vector<1x256xf32> to vector<4x256xf32>
    %15 = arith.mulf %11, %14 : vector<4x256xf32>
    %c0_13 = arith.constant 0 : index
    %c0_14 = arith.constant 0 : index
    %c0_15 = arith.constant 0 : index
    %16 = vector.load %arg2[%c0_13, %c0_14, %c0_15] : memref<9x8x4xf32, #tpu.memory_space<vmem>>, vector<1x8x4xf32>
    %17 = vector.shape_cast %16 : vector<1x8x4xf32> to vector<8x4xf32>
    %cst_16 = arith.constant dense<0.000000e+00> : vector<8x256xf32>
    %18 = tpu.matmul %17, %15, %cst_16 {dimension_numbers = #tpu.dot_dimension_numbers<[1], [0], [0], [1], [0, 0, 1, 1], [], []>} : vector<8x4xf32>, vector<4x256xf32>, vector<8x256xf32> -> vector<8x256xf32>
    %19 = arith.addf %10, %18 : vector<8x256xf32>
    %c0_17 = arith.constant 0 : index
    %c240 = arith.constant 240 : index
    %20 = vector.load %arg9[%c0_17, %c240] : memref<4x512xf32, #tpu.memory_space<vmem>>, vector<4x256xf32>
    %c1 = arith.constant 1 : index
    %c0_18 = arith.constant 0 : index
    %c0_19 = arith.constant 0 : index
    %21 = vector.load %arg3[%c1, %c0_18, %c0_19] : memref<9x1x256xf32, #tpu.memory_space<vmem>>, vector<1x1x256xf32>
    %22 = vector.shape_cast %21 : vector<1x1x256xf32> to vector<1x256xf32>
    %23 = vector.broadcast %22 : vector<1x256xf32> to vector<4x256xf32>
    %24 = arith.mulf %20, %23 : vector<4x256xf32>
    %c1_20 = arith.constant 1 : index
    %c0_21 = arith.constant 0 : index
    %c0_22 = arith.constant 0 : index
    %25 = vector.load %arg2[%c1_20, %c0_21, %c0_22] : memref<9x8x4xf32, #tpu.memory_space<vmem>>, vector<1x8x4xf32>
    %26 = vector.shape_cast %25 : vector<1x8x4xf32> to vector<8x4xf32>
    %cst_23 = arith.constant dense<0.000000e+00> : vector<8x256xf32>
    %27 = tpu.matmul %26, %24, %cst_23 {dimension_numbers = #tpu.dot_dimension_numbers<[1], [0], [0], [1], [0, 0, 1, 1], [], []>} : vector<8x4xf32>, vector<4x256xf32>, vector<8x256xf32> -> vector<8x256xf32>
    %28 = arith.addf %19, %27 : vector<8x256xf32>
    %c0_24 = arith.constant 0 : index
    %c241 = arith.constant 241 : index
    %29 = vector.load %arg9[%c0_24, %c241] : memref<4x512xf32, #tpu.memory_space<vmem>>, vector<4x256xf32>
    %c2 = arith.constant 2 : index
    %c0_25 = arith.constant 0 : index
    %c0_26 = arith.constant 0 : index
    %30 = vector.load %arg3[%c2, %c0_25, %c0_26] : memref<9x1x256xf32, #tpu.memory_space<vmem>>, vector<1x1x256xf32>
    %31 = vector.shape_cast %30 : vector<1x1x256xf32> to vector<1x256xf32>
    %32 = vector.broadcast %31 : vector<1x256xf32> to vector<4x256xf32>
    %33 = arith.mulf %29, %32 : vector<4x256xf32>
    %c2_27 = arith.constant 2 : index
    %c0_28 = arith.constant 0 : index
    %c0_29 = arith.constant 0 : index
    %34 = vector.load %arg2[%c2_27, %c0_28, %c0_29] : memref<9x8x4xf32, #tpu.memory_space<vmem>>, vector<1x8x4xf32>
    %35 = vector.shape_cast %34 : vector<1x8x4xf32> to vector<8x4xf32>
    %cst_30 = arith.constant dense<0.000000e+00> : vector<8x256xf32>
    %36 = tpu.matmul %35, %33, %cst_30 {dimension_numbers = #tpu.dot_dimension_numbers<[1], [0], [0], [1], [0, 0, 1, 1], [], []>} : vector<8x4xf32>, vector<4x256xf32>, vector<8x256xf32> -> vector<8x256xf32>
    %37 = arith.addf %28, %36 : vector<8x256xf32>
    %c0_31 = arith.constant 0 : index
    %c255 = arith.constant 255 : index
    %38 = vector.load %arg9[%c0_31, %c255] : memref<4x512xf32, #tpu.memory_space<vmem>>, vector<4x256xf32>
    %c3 = arith.constant 3 : index
    %c0_32 = arith.constant 0 : index
    %c0_33 = arith.constant 0 : index
    %39 = vector.load %arg3[%c3, %c0_32, %c0_33] : memref<9x1x256xf32, #tpu.memory_space<vmem>>, vector<1x1x256xf32>
    %40 = vector.shape_cast %39 : vector<1x1x256xf32> to vector<1x256xf32>
    %41 = vector.broadcast %40 : vector<1x256xf32> to vector<4x256xf32>
    %42 = arith.mulf %38, %41 : vector<4x256xf32>
    %c3_34 = arith.constant 3 : index
    %c0_35 = arith.constant 0 : index
    %c0_36 = arith.constant 0 : index
    %43 = vector.load %arg2[%c3_34, %c0_35, %c0_36] : memref<9x8x4xf32, #tpu.memory_space<vmem>>, vector<1x8x4xf32>
    %44 = vector.shape_cast %43 : vector<1x8x4xf32> to vector<8x4xf32>
    %cst_37 = arith.constant dense<0.000000e+00> : vector<8x256xf32>
    %45 = tpu.matmul %44, %42, %cst_37 {dimension_numbers = #tpu.dot_dimension_numbers<[1], [0], [0], [1], [0, 0, 1, 1], [], []>} : vector<8x4xf32>, vector<4x256xf32>, vector<8x256xf32> -> vector<8x256xf32>
    %46 = arith.addf %37, %45 : vector<8x256xf32>
    %c4 = arith.constant 4 : index
    %c0_38 = arith.constant 0 : index
    %c0_39 = arith.constant 0 : index
    %47 = vector.load %arg2[%c4, %c0_38, %c0_39] : memref<9x8x4xf32, #tpu.memory_space<vmem>>, vector<1x8x4xf32>
    %48 = vector.shape_cast %47 : vector<1x8x4xf32> to vector<8x4xf32>
    %cst_40 = arith.constant dense<0.000000e+00> : vector<8x256xf32>
    %49 = tpu.matmul %48, %7, %cst_40 {dimension_numbers = #tpu.dot_dimension_numbers<[1], [0], [0], [1], [0, 0, 1, 1], [], []>} : vector<8x4xf32>, vector<4x256xf32>, vector<8x256xf32> -> vector<8x256xf32>
    %50 = arith.addf %46, %49 : vector<8x256xf32>
    %c0_41 = arith.constant 0 : index
    %c1_42 = arith.constant 1 : index
    %51 = vector.load %arg9[%c0_41, %c1_42] : memref<4x512xf32, #tpu.memory_space<vmem>>, vector<4x256xf32>
    %c5 = arith.constant 5 : index
    %c0_43 = arith.constant 0 : index
    %c0_44 = arith.constant 0 : index
    %52 = vector.load %arg3[%c5, %c0_43, %c0_44] : memref<9x1x256xf32, #tpu.memory_space<vmem>>, vector<1x1x256xf32>
    %53 = vector.shape_cast %52 : vector<1x1x256xf32> to vector<1x256xf32>
    %54 = vector.broadcast %53 : vector<1x256xf32> to vector<4x256xf32>
    %55 = arith.mulf %51, %54 : vector<4x256xf32>
    %c5_45 = arith.constant 5 : index
    %c0_46 = arith.constant 0 : index
    %c0_47 = arith.constant 0 : index
    %56 = vector.load %arg2[%c5_45, %c0_46, %c0_47] : memref<9x8x4xf32, #tpu.memory_space<vmem>>, vector<1x8x4xf32>
    %57 = vector.shape_cast %56 : vector<1x8x4xf32> to vector<8x4xf32>
    %cst_48 = arith.constant dense<0.000000e+00> : vector<8x256xf32>
    %58 = tpu.matmul %57, %55, %cst_48 {dimension_numbers = #tpu.dot_dimension_numbers<[1], [0], [0], [1], [0, 0, 1, 1], [], []>} : vector<8x4xf32>, vector<4x256xf32>, vector<8x256xf32> -> vector<8x256xf32>
    %59 = arith.addf %50, %58 : vector<8x256xf32>
    %c0_49 = arith.constant 0 : index
    %c15 = arith.constant 15 : index
    %60 = vector.load %arg9[%c0_49, %c15] : memref<4x512xf32, #tpu.memory_space<vmem>>, vector<4x256xf32>
    %c6 = arith.constant 6 : index
    %c0_50 = arith.constant 0 : index
    %c0_51 = arith.constant 0 : index
    %61 = vector.load %arg3[%c6, %c0_50, %c0_51] : memref<9x1x256xf32, #tpu.memory_space<vmem>>, vector<1x1x256xf32>
    %62 = vector.shape_cast %61 : vector<1x1x256xf32> to vector<1x256xf32>
    %63 = vector.broadcast %62 : vector<1x256xf32> to vector<4x256xf32>
    %64 = arith.mulf %60, %63 : vector<4x256xf32>
    %c6_52 = arith.constant 6 : index
    %c0_53 = arith.constant 0 : index
    %c0_54 = arith.constant 0 : index
    %65 = vector.load %arg2[%c6_52, %c0_53, %c0_54] : memref<9x8x4xf32, #tpu.memory_space<vmem>>, vector<1x8x4xf32>
    %66 = vector.shape_cast %65 : vector<1x8x4xf32> to vector<8x4xf32>
    %cst_55 = arith.constant dense<0.000000e+00> : vector<8x256xf32>
    %67 = tpu.matmul %66, %64, %cst_55 {dimension_numbers = #tpu.dot_dimension_numbers<[1], [0], [0], [1], [0, 0, 1, 1], [], []>} : vector<8x4xf32>, vector<4x256xf32>, vector<8x256xf32> -> vector<8x256xf32>
    %68 = arith.addf %59, %67 : vector<8x256xf32>
    %c0_56 = arith.constant 0 : index
    %c16 = arith.constant 16 : index
    %69 = vector.load %arg9[%c0_56, %c16] : memref<4x512xf32, #tpu.memory_space<vmem>>, vector<4x256xf32>
    %c7 = arith.constant 7 : index
    %c0_57 = arith.constant 0 : index
    %c0_58 = arith.constant 0 : index
    %70 = vector.load %arg3[%c7, %c0_57, %c0_58] : memref<9x1x256xf32, #tpu.memory_space<vmem>>, vector<1x1x256xf32>
    %71 = vector.shape_cast %70 : vector<1x1x256xf32> to vector<1x256xf32>
    %72 = vector.broadcast %71 : vector<1x256xf32> to vector<4x256xf32>
    %73 = arith.mulf %69, %72 : vector<4x256xf32>
    %c7_59 = arith.constant 7 : index
    %c0_60 = arith.constant 0 : index
    %c0_61 = arith.constant 0 : index
    %74 = vector.load %arg2[%c7_59, %c0_60, %c0_61] : memref<9x8x4xf32, #tpu.memory_space<vmem>>, vector<1x8x4xf32>
    %75 = vector.shape_cast %74 : vector<1x8x4xf32> to vector<8x4xf32>
    %cst_62 = arith.constant dense<0.000000e+00> : vector<8x256xf32>
    %76 = tpu.matmul %75, %73, %cst_62 {dimension_numbers = #tpu.dot_dimension_numbers<[1], [0], [0], [1], [0, 0, 1, 1], [], []>} : vector<8x4xf32>, vector<4x256xf32>, vector<8x256xf32> -> vector<8x256xf32>
    %77 = arith.addf %68, %76 : vector<8x256xf32>
    %c0_63 = arith.constant 0 : index
    %c17 = arith.constant 17 : index
    %78 = vector.load %arg9[%c0_63, %c17] : memref<4x512xf32, #tpu.memory_space<vmem>>, vector<4x256xf32>
    %c8 = arith.constant 8 : index
    %c0_64 = arith.constant 0 : index
    %c0_65 = arith.constant 0 : index
    %79 = vector.load %arg3[%c8, %c0_64, %c0_65] : memref<9x1x256xf32, #tpu.memory_space<vmem>>, vector<1x1x256xf32>
    %80 = vector.shape_cast %79 : vector<1x1x256xf32> to vector<1x256xf32>
    %81 = vector.broadcast %80 : vector<1x256xf32> to vector<4x256xf32>
    %82 = arith.mulf %78, %81 : vector<4x256xf32>
    %c8_66 = arith.constant 8 : index
    %c0_67 = arith.constant 0 : index
    %c0_68 = arith.constant 0 : index
    %83 = vector.load %arg2[%c8_66, %c0_67, %c0_68] : memref<9x8x4xf32, #tpu.memory_space<vmem>>, vector<1x8x4xf32>
    %84 = vector.shape_cast %83 : vector<1x8x4xf32> to vector<8x4xf32>
    %cst_69 = arith.constant dense<0.000000e+00> : vector<8x256xf32>
    %85 = tpu.matmul %84, %82, %cst_69 {dimension_numbers = #tpu.dot_dimension_numbers<[1], [0], [0], [1], [0, 0, 1, 1], [], []>} : vector<8x4xf32>, vector<4x256xf32>, vector<8x256xf32> -> vector<8x256xf32>
    %86 = arith.addf %77, %85 : vector<8x256xf32>
    %c0_70 = arith.constant 0 : index
    %c0_71 = arith.constant 0 : index
    %c0_72 = arith.constant 0 : index
    %87 = vector.load %arg6[%c0_70, %c0_71, %c0_72] : memref<1x8x256xf32, #tpu.memory_space<vmem>>, vector<1x8x256xf32>
    %88 = vector.shape_cast %87 : vector<1x8x256xf32> to vector<8x256xf32>
    %89 = vector.shape_cast %86 : vector<8x256xf32> to vector<1x8x256xf32>
    tpu.vector_store %arg6[%c0_70, %c0_71, %c0_72], %89 {strides = array<i32>} : memref<1x8x256xf32, #tpu.memory_space<vmem>>, vector<1x8x256xf32>,
    %cst_73 = arith.constant dense<0.000000e+00> : vector<8xf32>
    %90 = vector.multi_reduction <add>, %86, %cst_73 [1] : vector<8x256xf32> to vector<8xf32>
    %91 = vector.shape_cast %90 : vector<8xf32> to vector<8x1xf32>
    %c0_74 = arith.constant 0 : index
    %c0_75 = arith.constant 0 : index
    %c0_76 = arith.constant 0 : index
    %92 = vector.load %arg7[%c0_74, %c0_75, %c0_76] : memref<1x8x1xf32, #tpu.memory_space<vmem>>, vector<1x8x1xf32>
    %93 = vector.shape_cast %92 : vector<1x8x1xf32> to vector<8x1xf32>
    %94 = vector.shape_cast %91 : vector<8x1xf32> to vector<1x8x1xf32>
    tpu.vector_store %arg7[%c0_74, %c0_75, %c0_76], %94 {strides = array<i32>} : memref<1x8x1xf32, #tpu.memory_space<vmem>>, vector<1x8x1xf32>,
    %95 = arith.mulf %86, %86 : vector<8x256xf32>
    %cst_77 = arith.constant dense<0.000000e+00> : vector<8xf32>
    %96 = vector.multi_reduction <add>, %95, %cst_77 [1] : vector<8x256xf32> to vector<8xf32>
    %97 = vector.shape_cast %96 : vector<8xf32> to vector<8x1xf32>
    %c0_78 = arith.constant 0 : index
    %c0_79 = arith.constant 0 : index
    %c0_80 = arith.constant 0 : index
    %98 = vector.load %arg8[%c0_78, %c0_79, %c0_80] : memref<1x8x1xf32, #tpu.memory_space<vmem>>, vector<1x8x1xf32>
    %99 = vector.shape_cast %98 : vector<1x8x1xf32> to vector<8x1xf32>
    %100 = vector.shape_cast %97 : vector<8x1xf32> to vector<1x8x1xf32>
    tpu.vector_store %arg8[%c0_78, %c0_79, %c0_80], %100 {strides = array<i32>} : memref<1x8x1xf32, #tpu.memory_space<vmem>>, vector<1x8x1xf32>,
    return
  }
  func.func @transform_0(%arg0: i32) -> (i32, i32, i32) {
    %c0_i32 = arith.constant 0 : i32
    %c0_i32_0 = arith.constant 0 : i32
    %c0_i32_1 = arith.constant 0 : i32
    return %arg0, %c0_i32, %c0_i32_0 : i32, i32, i32
  }
  func.func @transform_1(%arg0: i32) -> (i32, i32, i32) {
    %c0_i32 = arith.constant 0 : i32
    %c0_i32_0 = arith.constant 0 : i32
    %c0_i32_1 = arith.constant 0 : i32
    %c0_i32_2 = arith.constant 0 : i32
    return %c0_i32, %c0_i32_0, %c0_i32_1 : i32, i32, i32
  }
  func.func @transform_2(%arg0: i32) -> (i32, i32, i32) {
    %c0_i32 = arith.constant 0 : i32
    %c0_i32_0 = arith.constant 0 : i32
    %c0_i32_1 = arith.constant 0 : i32
    %c0_i32_2 = arith.constant 0 : i32
    return %c0_i32, %c0_i32_0, %c0_i32_1 : i32, i32, i32
  }
  func.func @transform_3(%arg0: i32) -> (i32, i32) {
    %c0_i32 = arith.constant 0 : i32
    %c0_i32_0 = arith.constant 0 : i32
    %c0_i32_1 = arith.constant 0 : i32
    return %c0_i32, %c0_i32_0 : i32, i32
  }
  func.func @transform_4(%arg0: i32) -> (i32, i32) {
    %c0_i32 = arith.constant 0 : i32
    %c0_i32_0 = arith.constant 0 : i32
    %c0_i32_1 = arith.constant 0 : i32
    return %c0_i32, %c0_i32_0 : i32, i32
  }
  func.func @transform_5(%arg0: i32) -> (i32, i32, i32) {
    %c0_i32 = arith.constant 0 : i32
    %c0_i32_0 = arith.constant 0 : i32
    %c0_i32_1 = arith.constant 0 : i32
    return %arg0, %c0_i32, %c0_i32_0 : i32, i32, i32
  }
  func.func @transform_6(%arg0: i32) -> (i32, i32, i32) {
    %c0_i32 = arith.constant 0 : i32
    %c0_i32_0 = arith.constant 0 : i32
    %c0_i32_1 = arith.constant 0 : i32
    return %arg0, %c0_i32, %c0_i32_0 : i32, i32, i32
  }
  func.func @transform_7(%arg0: i32) -> (i32, i32, i32) {
    %c0_i32 = arith.constant 0 : i32
    %c0_i32_0 = arith.constant 0 : i32
    %c0_i32_1 = arith.constant 0 : i32
    return %arg0, %c0_i32, %c0_i32_0 : i32, i32, i32
  }
}

module attributes {stable_mosaic.version = 11 : i64} {
  func.func @_conv_bn_stats_kernel(%arg0: i32, %arg1: memref<1x8x256xf32, #tpu.memory_space<vmem>>, %arg2: memref<9x8x8xf32, #tpu.memory_space<vmem>>, %arg3: memref<9x1x256xf32, #tpu.memory_space<vmem>>, %arg4: memref<8x1xf32, #tpu.memory_space<vmem>>, %arg5: memref<8x1xf32, #tpu.memory_space<vmem>>, %arg6: memref<1x8x256xf32, #tpu.memory_space<vmem>>, %arg7: memref<1x8x1xf32, #tpu.memory_space<vmem>>, %arg8: memref<1x8x1xf32, #tpu.memory_space<vmem>>, %arg9: memref<8x512xf32, #tpu.memory_space<vmem>>) attributes {dimension_semantics = [#tpu.dimension_semantics<parallel>], iteration_bounds = array<i64: 2>, scalar_prefetch = 0 : i64, scratch_operands = 1 : i64, tpu.core_type = #tpu.core_type<tc>, window_params = [{transform_indices = @transform_0, window_bounds = array<i64: 1, 8, 256>}, {pipeline_mode = #tpu.pipeline_mode<synchronous>, transform_indices = @transform_1, window_bounds = array<i64: 9, 8, 8>}, {pipeline_mode = #tpu.pipeline_mode<synchronous>, transform_indices = @transform_2, window_bounds = array<i64: 9, 1, 256>}, {pipeline_mode = #tpu.pipeline_mode<synchronous>, transform_indices = @transform_3, window_bounds = array<i64: 8, 1>}, {pipeline_mode = #tpu.pipeline_mode<synchronous>, transform_indices = @transform_4, window_bounds = array<i64: 8, 1>}, {transform_indices = @transform_5, window_bounds = array<i64: 1, 8, 256>}, {transform_indices = @transform_6, window_bounds = array<i64: 1, 8, 1>}, {transform_indices = @transform_7, window_bounds = array<i64: 1, 8, 1>}]} {
    %c0 = arith.constant 0 : index
    %c0_0 = arith.constant 0 : index
    %c0_1 = arith.constant 0 : index
    %0 = vector.load %arg1[%c0, %c0_0, %c0_1] : memref<1x8x256xf32, #tpu.memory_space<vmem>>, vector<1x8x256xf32>
    %1 = vector.shape_cast %0 : vector<1x8x256xf32> to vector<8x256xf32>
    %c0_2 = arith.constant 0 : index
    %c0_3 = arith.constant 0 : index
    %2 = vector.load %arg4[%c0_2, %c0_3] : memref<8x1xf32, #tpu.memory_space<vmem>>, vector<8x1xf32>
    %3 = vector.broadcast %2 : vector<8x1xf32> to vector<8x256xf32>
    %4 = arith.mulf %1, %3 : vector<8x256xf32>
    %c0_4 = arith.constant 0 : index
    %c0_5 = arith.constant 0 : index
    %5 = vector.load %arg5[%c0_4, %c0_5] : memref<8x1xf32, #tpu.memory_space<vmem>>, vector<8x1xf32>
    %6 = vector.broadcast %5 : vector<8x1xf32> to vector<8x256xf32>
    %7 = arith.addf %4, %6 : vector<8x256xf32>
    %c0_6 = arith.constant 0 : index
    %c0_7 = arith.constant 0 : index
    %8 = vector.load %arg9[%c0_6, %c0_7] : memref<8x512xf32, #tpu.memory_space<vmem>>, vector<8x256xf32>
    tpu.vector_store %arg9[%c0_6, %c0_7], %7 {strides = array<i32>} : memref<8x512xf32, #tpu.memory_space<vmem>>, vector<8x256xf32>,
    %c0_8 = arith.constant 0 : index
    %c256 = arith.constant 256 : index
    %9 = vector.load %arg9[%c0_8, %c256] : memref<8x512xf32, #tpu.memory_space<vmem>>, vector<8x256xf32>
    tpu.vector_store %arg9[%c0_8, %c256], %7 {strides = array<i32>} : memref<8x512xf32, #tpu.memory_space<vmem>>, vector<8x256xf32>,
    %cst = arith.constant 0.000000e+00 : f32
    %10 = vector.broadcast %cst : f32 to vector<8x256xf32>
    %c0_9 = arith.constant 0 : index
    %c239 = arith.constant 239 : index
    %11 = vector.load %arg9[%c0_9, %c239] : memref<8x512xf32, #tpu.memory_space<vmem>>, vector<8x256xf32>
    %c0_10 = arith.constant 0 : index
    %c0_11 = arith.constant 0 : index
    %c0_12 = arith.constant 0 : index
    %12 = vector.load %arg3[%c0_10, %c0_11, %c0_12] : memref<9x1x256xf32, #tpu.memory_space<vmem>>, vector<1x1x256xf32>
    %13 = vector.shape_cast %12 : vector<1x1x256xf32> to vector<1x256xf32>
    %14 = vector.broadcast %13 : vector<1x256xf32> to vector<8x256xf32>
    %15 = arith.mulf %11, %14 : vector<8x256xf32>
    %c0_13 = arith.constant 0 : index
    %c0_14 = arith.constant 0 : index
    %c0_15 = arith.constant 0 : index
    %16 = vector.load %arg2[%c0_13, %c0_14, %c0_15] : memref<9x8x8xf32, #tpu.memory_space<vmem>>, vector<1x8x8xf32>
    %17 = vector.shape_cast %16 : vector<1x8x8xf32> to vector<8x8xf32>
    %cst_16 = arith.constant dense<0.000000e+00> : vector<8x256xf32>
    %18 = tpu.matmul %17, %15, %cst_16 {dimension_numbers = #tpu.dot_dimension_numbers<[1], [0], [0], [1], [0, 0, 1, 1], [], []>} : vector<8x8xf32>, vector<8x256xf32>, vector<8x256xf32> -> vector<8x256xf32>
    %19 = arith.addf %10, %18 : vector<8x256xf32>
    %c0_17 = arith.constant 0 : index
    %c240 = arith.constant 240 : index
    %20 = vector.load %arg9[%c0_17, %c240] : memref<8x512xf32, #tpu.memory_space<vmem>>, vector<8x256xf32>
    %c1 = arith.constant 1 : index
    %c0_18 = arith.constant 0 : index
    %c0_19 = arith.constant 0 : index
    %21 = vector.load %arg3[%c1, %c0_18, %c0_19] : memref<9x1x256xf32, #tpu.memory_space<vmem>>, vector<1x1x256xf32>
    %22 = vector.shape_cast %21 : vector<1x1x256xf32> to vector<1x256xf32>
    %23 = vector.broadcast %22 : vector<1x256xf32> to vector<8x256xf32>
    %24 = arith.mulf %20, %23 : vector<8x256xf32>
    %c1_20 = arith.constant 1 : index
    %c0_21 = arith.constant 0 : index
    %c0_22 = arith.constant 0 : index
    %25 = vector.load %arg2[%c1_20, %c0_21, %c0_22] : memref<9x8x8xf32, #tpu.memory_space<vmem>>, vector<1x8x8xf32>
    %26 = vector.shape_cast %25 : vector<1x8x8xf32> to vector<8x8xf32>
    %cst_23 = arith.constant dense<0.000000e+00> : vector<8x256xf32>
    %27 = tpu.matmul %26, %24, %cst_23 {dimension_numbers = #tpu.dot_dimension_numbers<[1], [0], [0], [1], [0, 0, 1, 1], [], []>} : vector<8x8xf32>, vector<8x256xf32>, vector<8x256xf32> -> vector<8x256xf32>
    %28 = arith.addf %19, %27 : vector<8x256xf32>
    %c0_24 = arith.constant 0 : index
    %c241 = arith.constant 241 : index
    %29 = vector.load %arg9[%c0_24, %c241] : memref<8x512xf32, #tpu.memory_space<vmem>>, vector<8x256xf32>
    %c2 = arith.constant 2 : index
    %c0_25 = arith.constant 0 : index
    %c0_26 = arith.constant 0 : index
    %30 = vector.load %arg3[%c2, %c0_25, %c0_26] : memref<9x1x256xf32, #tpu.memory_space<vmem>>, vector<1x1x256xf32>
    %31 = vector.shape_cast %30 : vector<1x1x256xf32> to vector<1x256xf32>
    %32 = vector.broadcast %31 : vector<1x256xf32> to vector<8x256xf32>
    %33 = arith.mulf %29, %32 : vector<8x256xf32>
    %c2_27 = arith.constant 2 : index
    %c0_28 = arith.constant 0 : index
    %c0_29 = arith.constant 0 : index
    %34 = vector.load %arg2[%c2_27, %c0_28, %c0_29] : memref<9x8x8xf32, #tpu.memory_space<vmem>>, vector<1x8x8xf32>
    %35 = vector.shape_cast %34 : vector<1x8x8xf32> to vector<8x8xf32>
    %cst_30 = arith.constant dense<0.000000e+00> : vector<8x256xf32>
    %36 = tpu.matmul %35, %33, %cst_30 {dimension_numbers = #tpu.dot_dimension_numbers<[1], [0], [0], [1], [0, 0, 1, 1], [], []>} : vector<8x8xf32>, vector<8x256xf32>, vector<8x256xf32> -> vector<8x256xf32>
    %37 = arith.addf %28, %36 : vector<8x256xf32>
    %c0_31 = arith.constant 0 : index
    %c255 = arith.constant 255 : index
    %38 = vector.load %arg9[%c0_31, %c255] : memref<8x512xf32, #tpu.memory_space<vmem>>, vector<8x256xf32>
    %c3 = arith.constant 3 : index
    %c0_32 = arith.constant 0 : index
    %c0_33 = arith.constant 0 : index
    %39 = vector.load %arg3[%c3, %c0_32, %c0_33] : memref<9x1x256xf32, #tpu.memory_space<vmem>>, vector<1x1x256xf32>
    %40 = vector.shape_cast %39 : vector<1x1x256xf32> to vector<1x256xf32>
    %41 = vector.broadcast %40 : vector<1x256xf32> to vector<8x256xf32>
    %42 = arith.mulf %38, %41 : vector<8x256xf32>
    %c3_34 = arith.constant 3 : index
    %c0_35 = arith.constant 0 : index
    %c0_36 = arith.constant 0 : index
    %43 = vector.load %arg2[%c3_34, %c0_35, %c0_36] : memref<9x8x8xf32, #tpu.memory_space<vmem>>, vector<1x8x8xf32>
    %44 = vector.shape_cast %43 : vector<1x8x8xf32> to vector<8x8xf32>
    %cst_37 = arith.constant dense<0.000000e+00> : vector<8x256xf32>
    %45 = tpu.matmul %44, %42, %cst_37 {dimension_numbers = #tpu.dot_dimension_numbers<[1], [0], [0], [1], [0, 0, 1, 1], [], []>} : vector<8x8xf32>, vector<8x256xf32>, vector<8x256xf32> -> vector<8x256xf32>
    %46 = arith.addf %37, %45 : vector<8x256xf32>
    %c4 = arith.constant 4 : index
    %c0_38 = arith.constant 0 : index
    %c0_39 = arith.constant 0 : index
    %47 = vector.load %arg2[%c4, %c0_38, %c0_39] : memref<9x8x8xf32, #tpu.memory_space<vmem>>, vector<1x8x8xf32>
    %48 = vector.shape_cast %47 : vector<1x8x8xf32> to vector<8x8xf32>
    %cst_40 = arith.constant dense<0.000000e+00> : vector<8x256xf32>
    %49 = tpu.matmul %48, %7, %cst_40 {dimension_numbers = #tpu.dot_dimension_numbers<[1], [0], [0], [1], [0, 0, 1, 1], [], []>} : vector<8x8xf32>, vector<8x256xf32>, vector<8x256xf32> -> vector<8x256xf32>
    %50 = arith.addf %46, %49 : vector<8x256xf32>
    %c0_41 = arith.constant 0 : index
    %c1_42 = arith.constant 1 : index
    %51 = vector.load %arg9[%c0_41, %c1_42] : memref<8x512xf32, #tpu.memory_space<vmem>>, vector<8x256xf32>
    %c5 = arith.constant 5 : index
    %c0_43 = arith.constant 0 : index
    %c0_44 = arith.constant 0 : index
    %52 = vector.load %arg3[%c5, %c0_43, %c0_44] : memref<9x1x256xf32, #tpu.memory_space<vmem>>, vector<1x1x256xf32>
    %53 = vector.shape_cast %52 : vector<1x1x256xf32> to vector<1x256xf32>
    %54 = vector.broadcast %53 : vector<1x256xf32> to vector<8x256xf32>
    %55 = arith.mulf %51, %54 : vector<8x256xf32>
    %c5_45 = arith.constant 5 : index
    %c0_46 = arith.constant 0 : index
    %c0_47 = arith.constant 0 : index
    %56 = vector.load %arg2[%c5_45, %c0_46, %c0_47] : memref<9x8x8xf32, #tpu.memory_space<vmem>>, vector<1x8x8xf32>
    %57 = vector.shape_cast %56 : vector<1x8x8xf32> to vector<8x8xf32>
    %cst_48 = arith.constant dense<0.000000e+00> : vector<8x256xf32>
    %58 = tpu.matmul %57, %55, %cst_48 {dimension_numbers = #tpu.dot_dimension_numbers<[1], [0], [0], [1], [0, 0, 1, 1], [], []>} : vector<8x8xf32>, vector<8x256xf32>, vector<8x256xf32> -> vector<8x256xf32>
    %59 = arith.addf %50, %58 : vector<8x256xf32>
    %c0_49 = arith.constant 0 : index
    %c15 = arith.constant 15 : index
    %60 = vector.load %arg9[%c0_49, %c15] : memref<8x512xf32, #tpu.memory_space<vmem>>, vector<8x256xf32>
    %c6 = arith.constant 6 : index
    %c0_50 = arith.constant 0 : index
    %c0_51 = arith.constant 0 : index
    %61 = vector.load %arg3[%c6, %c0_50, %c0_51] : memref<9x1x256xf32, #tpu.memory_space<vmem>>, vector<1x1x256xf32>
    %62 = vector.shape_cast %61 : vector<1x1x256xf32> to vector<1x256xf32>
    %63 = vector.broadcast %62 : vector<1x256xf32> to vector<8x256xf32>
    %64 = arith.mulf %60, %63 : vector<8x256xf32>
    %c6_52 = arith.constant 6 : index
    %c0_53 = arith.constant 0 : index
    %c0_54 = arith.constant 0 : index
    %65 = vector.load %arg2[%c6_52, %c0_53, %c0_54] : memref<9x8x8xf32, #tpu.memory_space<vmem>>, vector<1x8x8xf32>
    %66 = vector.shape_cast %65 : vector<1x8x8xf32> to vector<8x8xf32>
    %cst_55 = arith.constant dense<0.000000e+00> : vector<8x256xf32>
    %67 = tpu.matmul %66, %64, %cst_55 {dimension_numbers = #tpu.dot_dimension_numbers<[1], [0], [0], [1], [0, 0, 1, 1], [], []>} : vector<8x8xf32>, vector<8x256xf32>, vector<8x256xf32> -> vector<8x256xf32>
    %68 = arith.addf %59, %67 : vector<8x256xf32>
    %c0_56 = arith.constant 0 : index
    %c16 = arith.constant 16 : index
    %69 = vector.load %arg9[%c0_56, %c16] : memref<8x512xf32, #tpu.memory_space<vmem>>, vector<8x256xf32>
    %c7 = arith.constant 7 : index
    %c0_57 = arith.constant 0 : index
    %c0_58 = arith.constant 0 : index
    %70 = vector.load %arg3[%c7, %c0_57, %c0_58] : memref<9x1x256xf32, #tpu.memory_space<vmem>>, vector<1x1x256xf32>
    %71 = vector.shape_cast %70 : vector<1x1x256xf32> to vector<1x256xf32>
    %72 = vector.broadcast %71 : vector<1x256xf32> to vector<8x256xf32>
    %73 = arith.mulf %69, %72 : vector<8x256xf32>
    %c7_59 = arith.constant 7 : index
    %c0_60 = arith.constant 0 : index
    %c0_61 = arith.constant 0 : index
    %74 = vector.load %arg2[%c7_59, %c0_60, %c0_61] : memref<9x8x8xf32, #tpu.memory_space<vmem>>, vector<1x8x8xf32>
    %75 = vector.shape_cast %74 : vector<1x8x8xf32> to vector<8x8xf32>
    %cst_62 = arith.constant dense<0.000000e+00> : vector<8x256xf32>
    %76 = tpu.matmul %75, %73, %cst_62 {dimension_numbers = #tpu.dot_dimension_numbers<[1], [0], [0], [1], [0, 0, 1, 1], [], []>} : vector<8x8xf32>, vector<8x256xf32>, vector<8x256xf32> -> vector<8x256xf32>
    %77 = arith.addf %68, %76 : vector<8x256xf32>
    %c0_63 = arith.constant 0 : index
    %c17 = arith.constant 17 : index
    %78 = vector.load %arg9[%c0_63, %c17] : memref<8x512xf32, #tpu.memory_space<vmem>>, vector<8x256xf32>
    %c8 = arith.constant 8 : index
    %c0_64 = arith.constant 0 : index
    %c0_65 = arith.constant 0 : index
    %79 = vector.load %arg3[%c8, %c0_64, %c0_65] : memref<9x1x256xf32, #tpu.memory_space<vmem>>, vector<1x1x256xf32>
    %80 = vector.shape_cast %79 : vector<1x1x256xf32> to vector<1x256xf32>
    %81 = vector.broadcast %80 : vector<1x256xf32> to vector<8x256xf32>
    %82 = arith.mulf %78, %81 : vector<8x256xf32>
    %c8_66 = arith.constant 8 : index
    %c0_67 = arith.constant 0 : index
    %c0_68 = arith.constant 0 : index
    %83 = vector.load %arg2[%c8_66, %c0_67, %c0_68] : memref<9x8x8xf32, #tpu.memory_space<vmem>>, vector<1x8x8xf32>
    %84 = vector.shape_cast %83 : vector<1x8x8xf32> to vector<8x8xf32>
    %cst_69 = arith.constant dense<0.000000e+00> : vector<8x256xf32>
    %85 = tpu.matmul %84, %82, %cst_69 {dimension_numbers = #tpu.dot_dimension_numbers<[1], [0], [0], [1], [0, 0, 1, 1], [], []>} : vector<8x8xf32>, vector<8x256xf32>, vector<8x256xf32> -> vector<8x256xf32>
    %86 = arith.addf %77, %85 : vector<8x256xf32>
    %c0_70 = arith.constant 0 : index
    %c0_71 = arith.constant 0 : index
    %c0_72 = arith.constant 0 : index
    %87 = vector.load %arg6[%c0_70, %c0_71, %c0_72] : memref<1x8x256xf32, #tpu.memory_space<vmem>>, vector<1x8x256xf32>
    %88 = vector.shape_cast %87 : vector<1x8x256xf32> to vector<8x256xf32>
    %89 = vector.shape_cast %86 : vector<8x256xf32> to vector<1x8x256xf32>
    tpu.vector_store %arg6[%c0_70, %c0_71, %c0_72], %89 {strides = array<i32>} : memref<1x8x256xf32, #tpu.memory_space<vmem>>, vector<1x8x256xf32>,
    %cst_73 = arith.constant dense<0.000000e+00> : vector<8xf32>
    %90 = vector.multi_reduction <add>, %86, %cst_73 [1] : vector<8x256xf32> to vector<8xf32>
    %91 = vector.shape_cast %90 : vector<8xf32> to vector<8x1xf32>
    %c0_74 = arith.constant 0 : index
    %c0_75 = arith.constant 0 : index
    %c0_76 = arith.constant 0 : index
    %92 = vector.load %arg7[%c0_74, %c0_75, %c0_76] : memref<1x8x1xf32, #tpu.memory_space<vmem>>, vector<1x8x1xf32>
    %93 = vector.shape_cast %92 : vector<1x8x1xf32> to vector<8x1xf32>
    %94 = vector.shape_cast %91 : vector<8x1xf32> to vector<1x8x1xf32>
    tpu.vector_store %arg7[%c0_74, %c0_75, %c0_76], %94 {strides = array<i32>} : memref<1x8x1xf32, #tpu.memory_space<vmem>>, vector<1x8x1xf32>,
    %95 = arith.mulf %86, %86 : vector<8x256xf32>
    %cst_77 = arith.constant dense<0.000000e+00> : vector<8xf32>
    %96 = vector.multi_reduction <add>, %95, %cst_77 [1] : vector<8x256xf32> to vector<8xf32>
    %97 = vector.shape_cast %96 : vector<8xf32> to vector<8x1xf32>
    %c0_78 = arith.constant 0 : index
    %c0_79 = arith.constant 0 : index
    %c0_80 = arith.constant 0 : index
    %98 = vector.load %arg8[%c0_78, %c0_79, %c0_80] : memref<1x8x1xf32, #tpu.memory_space<vmem>>, vector<1x8x1xf32>
    %99 = vector.shape_cast %98 : vector<1x8x1xf32> to vector<8x1xf32>
    %100 = vector.shape_cast %97 : vector<8x1xf32> to vector<1x8x1xf32>
    tpu.vector_store %arg8[%c0_78, %c0_79, %c0_80], %100 {strides = array<i32>} : memref<1x8x1xf32, #tpu.memory_space<vmem>>, vector<1x8x1xf32>,
    return
  }
  func.func @transform_0(%arg0: i32) -> (i32, i32, i32) {
    %c0_i32 = arith.constant 0 : i32
    %c0_i32_0 = arith.constant 0 : i32
    %c0_i32_1 = arith.constant 0 : i32
    return %arg0, %c0_i32, %c0_i32_0 : i32, i32, i32
  }
  func.func @transform_1(%arg0: i32) -> (i32, i32, i32) {
    %c0_i32 = arith.constant 0 : i32
    %c0_i32_0 = arith.constant 0 : i32
    %c0_i32_1 = arith.constant 0 : i32
    %c0_i32_2 = arith.constant 0 : i32
    return %c0_i32, %c0_i32_0, %c0_i32_1 : i32, i32, i32
  }
  func.func @transform_2(%arg0: i32) -> (i32, i32, i32) {
    %c0_i32 = arith.constant 0 : i32
    %c0_i32_0 = arith.constant 0 : i32
    %c0_i32_1 = arith.constant 0 : i32
    %c0_i32_2 = arith.constant 0 : i32
    return %c0_i32, %c0_i32_0, %c0_i32_1 : i32, i32, i32
  }
  func.func @transform_3(%arg0: i32) -> (i32, i32) {
    %c0_i32 = arith.constant 0 : i32
    %c0_i32_0 = arith.constant 0 : i32
    %c0_i32_1 = arith.constant 0 : i32
    return %c0_i32, %c0_i32_0 : i32, i32
  }
  func.func @transform_4(%arg0: i32) -> (i32, i32) {
    %c0_i32 = arith.constant 0 : i32
    %c0_i32_0 = arith.constant 0 : i32
    %c0_i32_1 = arith.constant 0 : i32
    return %c0_i32, %c0_i32_0 : i32, i32
  }
  func.func @transform_5(%arg0: i32) -> (i32, i32, i32) {
    %c0_i32 = arith.constant 0 : i32
    %c0_i32_0 = arith.constant 0 : i32
    %c0_i32_1 = arith.constant 0 : i32
    return %arg0, %c0_i32, %c0_i32_0 : i32, i32, i32
  }
  func.func @transform_6(%arg0: i32) -> (i32, i32, i32) {
    %c0_i32 = arith.constant 0 : i32
    %c0_i32_0 = arith.constant 0 : i32
    %c0_i32_1 = arith.constant 0 : i32
    return %arg0, %c0_i32, %c0_i32_0 : i32, i32, i32
  }
  func.func @transform_7(%arg0: i32) -> (i32, i32, i32) {
    %c0_i32 = arith.constant 0 : i32
    %c0_i32_0 = arith.constant 0 : i32
    %c0_i32_1 = arith.constant 0 : i32
    return %arg0, %c0_i32, %c0_i32_0 : i32, i32, i32
  }
}

module attributes {stable_mosaic.version = 11 : i64} {
  func.func @_bn_relu_kernel(%arg0: i32, %arg1: memref<1x8x256xf32, #tpu.memory_space<vmem>>, %arg2: memref<8x1xf32, #tpu.memory_space<vmem>>, %arg3: memref<8x1xf32, #tpu.memory_space<vmem>>, %arg4: memref<1x8x256xf32, #tpu.memory_space<vmem>>) attributes {dimension_semantics = [#tpu.dimension_semantics<parallel>], iteration_bounds = array<i64: 2>, scalar_prefetch = 0 : i64, scratch_operands = 0 : i64, tpu.core_type = #tpu.core_type<tc>, window_params = [{transform_indices = @transform_0, window_bounds = array<i64: 1, 8, 256>}, {pipeline_mode = #tpu.pipeline_mode<synchronous>, transform_indices = @transform_1, window_bounds = array<i64: 8, 1>}, {pipeline_mode = #tpu.pipeline_mode<synchronous>, transform_indices = @transform_2, window_bounds = array<i64: 8, 1>}, {transform_indices = @transform_3, window_bounds = array<i64: 1, 8, 256>}]} {
    %c0 = arith.constant 0 : index
    %c0_0 = arith.constant 0 : index
    %c0_1 = arith.constant 0 : index
    %0 = vector.load %arg1[%c0, %c0_0, %c0_1] : memref<1x8x256xf32, #tpu.memory_space<vmem>>, vector<1x8x256xf32>
    %1 = vector.shape_cast %0 : vector<1x8x256xf32> to vector<8x256xf32>
    %c0_2 = arith.constant 0 : index
    %c0_3 = arith.constant 0 : index
    %2 = vector.load %arg2[%c0_2, %c0_3] : memref<8x1xf32, #tpu.memory_space<vmem>>, vector<8x1xf32>
    %3 = vector.broadcast %2 : vector<8x1xf32> to vector<8x256xf32>
    %4 = arith.mulf %1, %3 : vector<8x256xf32>
    %c0_4 = arith.constant 0 : index
    %c0_5 = arith.constant 0 : index
    %5 = vector.load %arg3[%c0_4, %c0_5] : memref<8x1xf32, #tpu.memory_space<vmem>>, vector<8x1xf32>
    %6 = vector.broadcast %5 : vector<8x1xf32> to vector<8x256xf32>
    %7 = arith.addf %4, %6 : vector<8x256xf32>
    %cst = arith.constant 0.000000e+00 : f32
    %8 = vector.broadcast %cst : f32 to vector<8x256xf32>
    %9 = arith.maximumf %7, %8 : vector<8x256xf32>
    %c0_6 = arith.constant 0 : index
    %c0_7 = arith.constant 0 : index
    %c0_8 = arith.constant 0 : index
    %10 = vector.load %arg4[%c0_6, %c0_7, %c0_8] : memref<1x8x256xf32, #tpu.memory_space<vmem>>, vector<1x8x256xf32>
    %11 = vector.shape_cast %10 : vector<1x8x256xf32> to vector<8x256xf32>
    %12 = vector.shape_cast %9 : vector<8x256xf32> to vector<1x8x256xf32>
    tpu.vector_store %arg4[%c0_6, %c0_7, %c0_8], %12 {strides = array<i32>} : memref<1x8x256xf32, #tpu.memory_space<vmem>>, vector<1x8x256xf32>,
    return
  }
  func.func @transform_0(%arg0: i32) -> (i32, i32, i32) {
    %c0_i32 = arith.constant 0 : i32
    %c0_i32_0 = arith.constant 0 : i32
    %c0_i32_1 = arith.constant 0 : i32
    return %arg0, %c0_i32, %c0_i32_0 : i32, i32, i32
  }
  func.func @transform_1(%arg0: i32) -> (i32, i32) {
    %c0_i32 = arith.constant 0 : i32
    %c0_i32_0 = arith.constant 0 : i32
    %c0_i32_1 = arith.constant 0 : i32
    return %c0_i32, %c0_i32_0 : i32, i32
  }
  func.func @transform_2(%arg0: i32) -> (i32, i32) {
    %c0_i32 = arith.constant 0 : i32
    %c0_i32_0 = arith.constant 0 : i32
    %c0_i32_1 = arith.constant 0 : i32
    return %c0_i32, %c0_i32_0 : i32, i32
  }
  func.func @transform_3(%arg0: i32) -> (i32, i32, i32) {
    %c0_i32 = arith.constant 0 : i32
    %c0_i32_0 = arith.constant 0 : i32
    %c0_i32_1 = arith.constant 0 : i32
    return %arg0, %c0_i32, %c0_i32_0 : i32, i32, i32
  }
}

</mosaic_0001>

<bundles_post_ra>
// kernel: convolution_block_forward.5
= control target key start
LH: loop header
LB: loop body
LE: loop exit
PB: predicated region body
PF: predicated region fallthrough
CT: control target
= control target key end

     0   :  { %s300_s12 = smov 0   ;;  %s323_s0 = inlined_call_operand.vmem [shape: f32[2,8,256], index: 0, kind: input, shape index: {}]   ;;  %s324_s1 = inlined_call_operand.vmem [shape: f32[8,1], index: 1, kind: input, shape index: {}]   ;;  %s325_s2 = inlined_call_operand.vmem [shape: f32[8,1], index: 2, kind: input, shape index: {}]   ;;  %s326_s3 = inlined_call_operand.vmem [shape: f32[2,8,256], index: 3, kind: output, shape index: {}]  }
   0x1 LB: > { %s248_s13 = sadd.s32 4294967295, %s277_s12   ;;  %p252_p0 = scmp.ge.s32.totalorder %s277_s12, 1  ;;  %s277_s12 = sphi %s300_s12, %s13_s12  }
   0x2   : > { %p137_p1 = scmp.lt.s32.totalorder %s277_s12, 3 }
   0x4   : > { %p138_p2 = pnand %p252_p0, %p137_p1 }
   0x5   : > { %p161_p3 = scmp.lt.s32.totalorder (!%p138_p2), %s248_s13, 1 }
   0x6   : > { %141 = sbr.rel (%p138_p2) target bundleno = 142 (0x8e), region = 32 }
   0xb   : > { %v173_v0 = vld [vmem:[%s324_s1] sm:$0xff]  ;;  %v279_v1 = vmov 0   ;;  %s328_s13 = smov (!%p161_p3, %s248_s13), 1 }
   0xc   : > { %270 = vset.pattern.permute.xlu0 %v279_v1  ;;  %v181_v2 = vld [vmem:[%s325_s2] sm:$0xff]  ;;  %s259_s18 = sshll.u32 %s328_s13, 4 }
   0xd   : > { %176 = vperm.xlu0 %270, %v173_v0   ;;  %s165_s21 = scalar_lea.vmem %s323_s0, %s259_s18  ;;  %s170_s24 = scalar_lea.vmem %s326_s3, %s259_s18 }
   0xe   : > { %v171_v4 = vld [vmem:[%s165_s21] sm:$0xff]  ;;  %v172_v5 = vld [vmem:[%s165_s21 + $0x8] sm:$0xff] }
  0x15   : > { %184 = vperm.xlu0 %270, %v181_v2  }
  0x7f   : > { %v177_v3 = vpop.permute.xlu0 %176 }
  0x80   : > { %v179_v6 = vmul.f32 %v177_v3, %v171_v4  ;;  %v180_v7 = vmul.f32 %v177_v3, %v172_v5 }
  0x87   : > { %v185_v8 = vpop.permute.xlu0 %184 }
  0x88   : > { %v187_v9 = vadd.f32 %v185_v8, %v179_v6  ;;  %v188_v10 = vadd.f32 %v185_v8, %v180_v7 }
  0x8a   : > { %v189_v11 = vmax.f32 %v187_v9, 0.0  ;;  %v190_v12 = vmax.f32 %v188_v10, 0.0 }
  0x8c   : > { %191 = vst [vmem:[%s170_s24] sm:$0xff] %v189_v11 }
  0x8d   : > { %192 = vst [vmem:[%s170_s24 + $0x8] sm:$0xff] %v190_v12 }
  0x8e PF: > { %s13_s12 = sadd.s32 1, %s277_s12  }
  0x8f   : > { %p10_p4 = scmp.ge.s32.totalorder %s13_s12, 4  }
  0x91   :  { %12 = sbr.rel (!%p10_p4) target bundleno = 1 (0x1), region = 62 }

// kernel: convolution_block_forward.4
= control target key start
LH: loop header
LB: loop body
LE: loop exit
PB: predicated region body
PF: predicated region fallthrough
CT: control target
= control target key end

     0   :  { %s1278_s24 = smov 0   ;;  %s1476_s0 = inlined_call_operand.vmem [shape: f32[2,8,256], index: 0, kind: input, shape index: {}]   ;;  %s1477_s1 = inlined_call_operand.vmem [shape: f32[9,8,8], index: 1, kind: input, shape index: {}]   ;;  %s1478_s2 = inlined_call_operand.vmem [shape: f32[9,1,256], index: 2, kind: input, shape index: {}]   ;;  %s1479_s3 = inlined_call_operand.vmem [shape: f32[8,1], index: 3, kind: input, shape index: {}]   ;;  %s1480_s4 = inlined_call_operand.vmem [shape: f32[8,1], index: 4, kind: input, shape index: {}]   ;;  %s1481_s5 = inlined_call_operand.vmem [shape: f32[2,8,256], index: 5, kind: output, shape index: {0}]   ;;  %s1482_s6 = inlined_call_operand.vmem [shape: f32[2,8,1], index: 6, kind: output, shape index: {1}]   ;;  %s1483_s7 = inlined_call_operand.vmem [shape: f32[2,8,1], index: 7, kind: output, shape index: {2}]  }
   0x1 LB: > { %s1115_s25 = sadd.s32 4294967295, %s1227_s24   ;;  %p1119_p0 = scmp.ge.s32.totalorder %s1227_s24, 1  ;;  %s1227_s24 = sphi %s1278_s24, %s18_s24  }
   0x2   : > { %p242_p1 = scmp.lt.s32.totalorder %s1227_s24, 3 }
   0x4   : > { %p243_p2 = pnand %p1119_p0, %p242_p1 }
   0x5   : > { %s1230_s9 = smov (!%p243_p2), 112   ;;  %s1231_s10 = smov (!%p243_p2), 111  }
   0x6   : > { %246 = sbr.rel (%p243_p2) target bundleno = 551 (0x227), region = 40  ;;  %s1232_s17 = smov (!%p243_p2), 113  }
   0x7   : > { %s1233_s18 = smov (!%p243_p2), 127   ;;  %s1234_s21 = smov (!%p243_p2), 1  }
   0x8   : > { %s1235_s28 = smov (!%p243_p2), 15   ;;  %s1236_s29 = smov (!%p243_p2), 16  }
   0x9   : > { %s1237_s11 = smov (!%p243_p2), 17   ;;  %p282_p3 = scmp.lt.s32.totalorder (!%p243_p2), %s1115_s25, 1 }
   0xb   : > { %v302_v0 = vld [vmem:[%s1479_s3] sm:$0xff]  ;;  %v1229_v2 = vmov 0   ;;  %v1143_v14 = vld [vmem:[%s1478_s2 + $0xa] sm:$0x3]  ;;  %v1147_v18 = vld [vmem:[%s1478_s2 + $0xc] sm:$0x3] }
   0xc   : > { %v1126_v1 = vld [vmem:[%s1478_s2 + $0x2] sm:$0x3]  ;;  %1180 = vset.pattern.permute.xlu0 %v1229_v2  ;;  %v325_v4 = vld [vmem:[%s1478_s2] sm:$0x3]  ;;  %v1132_v9 = vld [vmem:[%s1478_s2 + $0x4] sm:$0x3] }
   0xd   : > { %v345_v3 = vperm.slane %v1126_v1, 0  ;;  %305 = vperm.xlu0 %1180, %v302_v0   ;;  %v327_v5 = vperm.slane %v325_v4, 0  ;;  %v346_v6 = vperm.slane %v1126_v1, 1  ;;  %v310_v7 = vld [vmem:[%s1480_s4] sm:$0xff]  ;;  %v328_v8 = vperm.slane %v325_v4, 1  ;;  %s1485_s25 = smov (!%p282_p3, %s1115_s25), 1 }
   0xe   : > { %v1136_v10 = vld [vmem:[%s1478_s2 + $0x6] sm:$0x3]  ;;  %v479_v11 = vperm.slane %v1132_v9, 0  ;;  %v480_v13 = vperm.slane %v1132_v9, 1  ;;  %v686_v16 = vperm.slane %v1143_v14, 1  ;;  %v685_v17 = vperm.slane %v1143_v14, 0 }
   0xf   : > { %347 = vrot.lane.b32.xlu2 %v345_v3, %s1230_s9  ;;  %329 = vrot.lane.b32.xlu1 %v327_v5, %s1231_s10  ;;  %v557_v12 = vperm.slane %v1136_v10, 0  ;;  %v558_v15 = vperm.slane %v1136_v10, 1  ;;  %v1151_v19 = vld [vmem:[%s1478_s2 + $0xe] sm:$0x3]  ;;  %v761_v20 = vperm.slane %v1147_v18, 0  ;;  %v762_v22 = vperm.slane %v1147_v18, 1 }
  0x10   : > { %v837_v21 = vperm.slane %v1151_v19, 0  ;;  %v1155_v23 = vld [vmem:[%s1478_s2 + $0x10] sm:$0x3]  ;;  %v838_v24 = vperm.slane %v1151_v19, 1  ;;  %s1161_s12 = sshll.u32 %s1485_s25, 4  ;;  %vm351_vm0 = vcmask 916480  }
  0x11   : > { %v914_v25 = vperm.slane %v1155_v23, 1  ;;  %v913_v26 = vperm.slane %v1155_v23, 0  ;;  %s286_s15 = scalar_lea.vmem %s1476_s0, %s1161_s12  ;;  %vm333_vm1 = vcmask 908288   ;;  %vm485_vm2 = vcmask 924672   ;;  %s291_s16 = scalar_lea.vmem %s1481_s5, %s1161_s12 }
  0x12   : > { %v300_v31 = vld [vmem:[%s286_s15] sm:$0xff]  ;;  %v301_v32 = vld [vmem:[%s286_s15 + $0x8] sm:$0xff]  ;;  %vm563_vm3 = vcmask 1039360   ;;  %vm582_vm4 = vcmask 7168   ;;  %vm504_vm5 = vcmask 121856   ;;  %vm370_vm6 = vcmask 130048  }
  0x13   : > { %vm428_vm7 = vcmask 138240   ;;  %vm375_vm8 = vcmask 64512  }
  0x15   : > { %313 = vperm.xlu0 %1180, %v310_v7  }
  0x17   : > { %349 = vrot.lane.b32.xlu2 %v346_v6, %s1230_s9  ;;  %331 = vrot.lane.b32.xlu1 %v328_v8, %s1231_s10 }
  0x1d   : > { %481 = vrot.lane.b32.xlu0 %v479_v11, %s1232_s17 }
  0x1f   : > { %559 = vrot.lane.b32.xlu2 %v557_v12, %s1233_s18  ;;  %483 = vrot.lane.b32.xlu1 %v480_v13, %s1232_s17 }
  0x25   : > { %561 = vrot.lane.b32.xlu0 %v558_v15, %s1233_s18 }
  0x27   : > { %689 = vrot.lane.b32.xlu2 %v686_v16, %s1234_s21  ;;  %687 = vrot.lane.b32.xlu1 %v685_v17, %s1234_s21 }
  0x2d   : > { %763 = vrot.lane.b32.xlu0 %v761_v20, %s1235_s28 }
  0x2f   : > { %839 = vrot.lane.b32.xlu2 %v837_v21, %s1236_s29  ;;  %765 = vrot.lane.b32.xlu1 %v762_v22, %s1235_s28 }
  0x35   : > { %841 = vrot.lane.b32.xlu0 %v838_v24, %s1236_s29 }
  0x37   : > { %917 = vrot.lane.b32.xlu2 %v914_v25, %s1237_s11  ;;  %915 = vrot.lane.b32.xlu1 %v913_v26, %s1237_s11 }
  0x69   : > { %v348_v27 = vpop.permute.xlu2 %347 }
  0x71   : > { %v350_v29 = vpop.permute.xlu2 %349 }
  0x72   : > { %v352_v39 = vsel %vm351_vm0, %v348_v27, %v350_v29 }
  0x79   : > { %v560_v42 = vpop.permute.xlu2 %559 }
  0x7f   : > { %v306_v28 = vpop.permute.xlu0 %305 }
  0x80   : > { %v308_v33 = vmul.f32 %v306_v28, %v300_v31  ;;  %v309_v34 = vmul.f32 %v306_v28, %v301_v32 }
  0x81   : > { %v330_v30 = vpop.permute.xlu1 %329  ;;  %v690_v54 = vpop.permute.xlu2 %689 }
  0x87   : > { %v314_v35 = vpop.permute.xlu0 %313 }
  0x88   : > { %v1344_v36 = vadd.f32 %v314_v35, %v308_v33  ;;  %v1346_v37 = vadd.f32 %v314_v35, %v309_v34 }
  0x89   : > { %v332_v38 = vpop.permute.xlu1 %331  ;;  %v840_v5 = vpop.permute.xlu2 %839 }
  0x8a   : > { %v334_v40 = vsel %vm333_vm1, %v330_v30, %v332_v38  ;;  %v358_v41 = vmul.f32 %v350_v29, %v1346_v37  ;;  %v356_v44 = vmul.f32 %v348_v27, %v1346_v37  ;;  %v357_v45 = vmul.f32 %v352_v39, %v1344_v36 }
  0x8b   : > { %v339_v43 = vmul.f32 %v334_v40, %v1344_v36  ;;  %v338_v46 = vmul.f32 %v330_v30, %v1346_v37  ;;  %v340_v55 = vmul.f32 %v332_v38, %v1346_v37  ;;  %v568_v62 = vmul.f32 %v560_v42, %v1346_v37  ;;  %v341_v30 = vld [vmem:[%s1477_s1] sm:$0xff]  ;;  %v1127_v40 = vld [vmem:[%s1477_s1 + $0x8] sm:$0xff] }
  0x8c   : > { %368 = vrot.lane.b32.xlu1 %v358_v41, %s1236_s29  ;;  %v1181_v47 = vpack.i.bf16 %v357_v45, %v356_v44  ;;  %v697_v12 = vmul.f32 %v690_v54, %v1344_v36  ;;  %v847_v16 = vmul.f32 %v840_v5, %v1344_v36 }
  0x8d   : > { %v1186_v48 = vpack.i.bf16 %v339_v43, %v338_v46 }
  0x8e   : > { %1182 = vrot.lane.b32.xlu0 %v1181_v47, %s1236_s29 }
  0x8f   : > { %1187 = vrot.lane.b32.xlu2 %v1186_v48, %s1237_s11  ;;  %v482_v49 = vpop.permute.xlu0 %481 }
  0x90   : > { %v490_v52 = vmul.f32 %v482_v49, %v1346_v37 }
  0x91   : > { %v484_v50 = vpop.permute.xlu1 %483  ;;  %v918_v17 = vpop.permute.xlu2 %917 }
  0x92   : > { %v486_v51 = vsel %vm485_vm2, %v482_v49, %v484_v50  ;;  %v492_v57 = vmul.f32 %v484_v50, %v1346_v37  ;;  %v925_v26 = vmul.f32 %v918_v17, %v1344_v36 }
  0x93   : > { %v491_v53 = vmul.f32 %v486_v51, %v1344_v36  ;;  %v1133_v51 = vld [vmem:[%s1477_s1 + $0x10] sm:$0xff] }
  0x95   : > { %v1191_v56 = vpack.i.bf16 %v491_v53, %v490_v52 }
  0x96   : > { %426 = vrot.lane.b32.xlu0 %v340_v55, %s1237_s11 }
  0x97   : > { %1192 = vrot.lane.b32.xlu1 %v1191_v56, %s1235_s28  ;;  %v562_v58 = vpop.permute.xlu0 %561  ;;  %502 = vrot.lane.b32.xlu2 %v492_v57, %s1235_s28 }
  0x98   : > { %v564_v59 = vsel %vm563_vm3, %v560_v42, %v562_v58  ;;  %v570_v3 = vmul.f32 %v562_v58, %v1346_v37  ;;  %v1137_v58 = vld [vmem:[%s1477_s1 + $0x18] sm:$0xff] }
  0x99   : > { %v569_v60 = vmul.f32 %v564_v59, %v1344_v36  ;;  %v688_v61 = vpop.permute.xlu1 %687 }
  0x9a   : > { %v691_v63 = vsel %vm582_vm4, %v688_v61, %v690_v54  ;;  %v695_v0 = vmul.f32 %v688_v61, %v1344_v36 }
  0x9b   : > { %v696_v1 = vmul.f32 %v691_v63, %v1346_v37  ;;  %v1196_v2 = vpack.i.bf16 %v569_v60, %v568_v62 }
  0x9d   : > { %v1201_v4 = vpack.i.bf16 %v696_v1, %v695_v0 }
  0x9e   : > { %1197 = vrot.lane.b32.xlu0 %v1196_v2, %s1234_s21 }
  0x9f   : > { %580 = vrot.lane.b32.xlu1 %v570_v3, %s1234_s21  ;;  %v764_v6 = vpop.permute.xlu0 %763  ;;  %1202 = vrot.lane.b32.xlu2 %v1201_v4, %s1233_s18 }
  0xa0   : > { %v771_v9 = vmul.f32 %v764_v6, %v1344_v36 }
  0xa1   : > { %v766_v7 = vpop.permute.xlu1 %765 }
  0xa2   : > { %v767_v8 = vsel %vm504_vm5, %v764_v6, %v766_v7  ;;  %v773_v13 = vmul.f32 %v766_v7, %v1344_v36 }
  0xa3   : > { %v772_v10 = vmul.f32 %v767_v8, %v1346_v37  ;;  %v1148_v8 = vld [vmem:[%s1477_s1 + $0x30] sm:$0xff] }
  0xa5   : > { %v1206_v11 = vpack.i.bf16 %v772_v10, %v771_v9 }
  0xa6   : > { %707 = vrot.lane.b32.xlu0 %v697_v12, %s1233_s18 }
  0xa7   : > { %1207 = vrot.lane.b32.xlu1 %v1206_v11, %s1232_s17  ;;  %v842_v14 = vpop.permute.xlu0 %841  ;;  %783 = vrot.lane.b32.xlu2 %v773_v13, %s1232_s17  ;;  %s1124_s17 = sshll.u32 %s1485_s25, 3 }
  0xa8   : > { %v843_v15 = vsel %vm370_vm6, %v840_v5, %v842_v14  ;;  %v849_v24 = vmul.f32 %v842_v14, %v1344_v36  ;;  %v1144_v5 = vld [vmem:[%s1477_s1 + $0x28] sm:$0xff]  ;;  %v1152_v14 = vld [vmem:[%s1477_s1 + $0x38] sm:$0xff]  ;;  %s295_s18 = scalar_lea.vmem %s1482_s6, %s1124_s17  ;;  %s299_s12 = scalar_lea.vmem %s1483_s7, %s1124_s17 }
  0xa9   : > { %v848_v18 = vmul.f32 %v843_v15, %v1346_v37  ;;  %v916_v19 = vpop.permute.xlu1 %915 }
  0xaa   : > { %v919_v20 = vsel %vm428_vm7, %v916_v19, %v918_v17  ;;  %v923_v21 = vmul.f32 %v916_v19, %v1344_v36  ;;  %v1156_v17 = vld [vmem:[%s1477_s1 + $0x40] sm:$0xff] }
  0xab   : > { %v924_v22 = vmul.f32 %v919_v20, %v1346_v37  ;;  %v1211_v23 = vpack.i.bf16 %v848_v18, %v847_v16 }
  0xad   : > { %v1216_v25 = vpack.i.bf16 %v924_v22, %v923_v21 }
  0xae   : > { %1212 = vrot.lane.b32.xlu0 %v1211_v23, %s1230_s9 }
  0xaf   : > { %859 = vrot.lane.b32.xlu1 %v849_v24, %s1230_s9  ;;  %1217 = vrot.lane.b32.xlu2 %v1216_v25, %s1231_s10 }
  0xb6   : > { %935 = vrot.lane.b32.xlu0 %v925_v26, %s1231_s10 }
  0xe9   : > { %v1188_v27 = vpop.permute.xlu2 %1187 }
  0xea   : > { %v1190_v28 = vunpack.i.h.bf16 %v1188_v27  ;;  %v1189_v29 = vunpack.i.l.bf16 %v1188_v27 }
  0xec   : > { %v429_v31 = vsel %vm428_vm7, %v1189_v29, %v1190_v28 }
  0xed   : > { %451 = vmatpush.msra.mxu2 %v429_v31 }
  0xee   : > { %1130 = vmatmul.msk.f32.vlgmr.msra.gmra.mxu2 %vm375_vm8, %v341_v30 }
  0xf1   : > { %v503_v32 = vpop.permute.xlu2 %502 }
  0xf9   : > { %v1203_v35 = vpop.permute.xlu2 %1202 }
  0xfa   : > { %v1205_v54 = vunpack.i.h.bf16 %v1203_v35  ;;  %v1204_v55 = vunpack.i.l.bf16 %v1203_v35 }
  0xfc   : > { %v709_v61 = vsel %vm563_vm3, %v1204_v55, %v1205_v54 }
  0xfe   : > { %v369_v33 = vpop.permute.xlu1 %368 }
 0x100   : > { %v1183_v34 = vpop.permute.xlu0 %1182 }
 0x101   : > { %v1185_v38 = vunpack.i.h.bf16 %v1183_v34  ;;  %v1184_v39 = vunpack.i.l.bf16 %v1183_v34  ;;  %v784_v48 = vpop.permute.xlu2 %783 }
 0x103   : > { %v371_v41 = vsel %vm370_vm6, %v1184_v39, %v1185_v38  ;;  %v372_v42 = vsel %vm370_vm6, %v1185_v38, %v369_v33 }
 0x104   : > { %394 = vmatpush.msra.mxu0 %v371_v41  ;;  %414 = vmatpush.msra.mxu1 %v372_v42 }
 0x105   : > { %1128 = vmatmul.msk.f32.vlgmr.msra.gmra.mxu0 %vm375_vm8, %v1127_v40  ;;  %1129 = vmatmul.msk.f32.vlgmr.msra.gmra.mxu1 %vm375_vm8, %v1127_v40 }
 0x108   : > { %v427_v44 = vpop.permute.xlu0 %426 }
 0x109   : > { %v1193_v43 = vpop.permute.xlu1 %1192  ;;  %v430_v47 = vsel %vm428_vm7, %v1190_v28, %v427_v44  ;;  %v1218_v60 = vpop.permute.xlu2 %1217 }
 0x10a   : > { %v1195_v45 = vunpack.i.h.bf16 %v1193_v43  ;;  %v1194_v46 = vunpack.i.l.bf16 %v1193_v43  ;;  %471 = vmatpush.msra.mxu3 %v430_v47  ;;  %v1220_v62 = vunpack.i.h.bf16 %v1218_v60  ;;  %v1219_v1 = vunpack.i.l.bf16 %v1218_v60 }
 0x10b   : > { %1131 = vmatmul.msk.f32.vlgmr.msra.gmra.mxu3 %vm375_vm8, %v341_v30 }
 0x10c   : > { %v505_v49 = vsel %vm504_vm5, %v1194_v46, %v1195_v45  ;;  %v506_v50 = vsel %vm504_vm5, %v1195_v45, %v503_v32  ;;  %v937_v9 = vsel %vm333_vm1, %v1219_v1, %v1220_v62 }
 0x10d   : > { %527 = vmatpush.msrb.mxu0 %v505_v49  ;;  %547 = vmatpush.msrb.mxu1 %v506_v50 }
 0x10e   : > { %1134 = vmatmul.msk.f32.vlgmr.msrb.gmra.mxu0 %vm375_vm8, %v1133_v51  ;;  %1135 = vmatmul.msk.f32.vlgmr.msrb.gmra.mxu1 %vm375_vm8, %v1133_v51 }
 0x10f   : > { %652 = vmatpush.msra.mxu0 %v1344_v36  ;;  %672 = vmatpush.msra.mxu1 %v1346_v37  ;;  %v1140_v37 = vld [vmem:[%s1477_s1 + $0x20] sm:$0xff] }
 0x110   : > { %v1198_v53 = vpop.permute.xlu0 %1197 }
 0x111   : > { %v581_v52 = vpop.permute.xlu1 %580  ;;  %v1200_v56 = vunpack.i.h.bf16 %v1198_v53  ;;  %v1199_v57 = vunpack.i.l.bf16 %v1198_v53 }
 0x113   : > { %v583_v59 = vsel %vm582_vm4, %v1199_v57, %v1200_v56  ;;  %v584_v36 = vsel %vm582_vm4, %v1200_v56, %v581_v52 }
 0x114   : > { %605 = vmatpush.msrb.mxu2 %v583_v59  ;;  %625 = vmatpush.msrb.mxu3 %v584_v36 }
 0x115   : > { %1138 = vmatmul.msk.f32.vlgmr.msrb.gmra.mxu2 %vm375_vm8, %v1137_v58  ;;  %1139 = vmatmul.msk.f32.vlgmr.msrb.gmra.mxu3 %vm375_vm8, %v1137_v58 }
 0x116   : > { %731 = vmatpush.msra.mxu2 %v709_v61  ;;  %1141 = vmatmul.msk.f32.vlgmr.msra.gmra.mxu0 %vm375_vm8, %v1140_v37 }
 0x117   : > { %1142 = vmatmul.msk.f32.vlgmr.msra.gmra.mxu1 %vm375_vm8, %v1140_v37 }
 0x118   : > { %v708_v0 = vpop.permute.xlu0 %707 }
 0x119   : > { %v1208_v63 = vpop.permute.xlu1 %1207  ;;  %v710_v4 = vsel %vm563_vm3, %v1205_v54, %v708_v0 }
 0x11a   : > { %v1210_v2 = vunpack.i.h.bf16 %v1208_v63  ;;  %v1209_v3 = vunpack.i.l.bf16 %v1208_v63  ;;  %751 = vmatpush.msra.mxu3 %v710_v4 }
 0x11c   : > { %v785_v6 = vsel %vm485_vm2, %v1209_v3, %v1210_v2  ;;  %v786_v7 = vsel %vm485_vm2, %v1210_v2, %v784_v48 }
 0x11d   : > { %807 = vmatpush.msrb.mxu0 %v785_v6  ;;  %827 = vmatpush.msrb.mxu1 %v786_v7 }
 0x11e   : > { %1145 = vmatmul.msk.f32.vlgmr.msra.gmra.mxu2 %vm375_vm8, %v1144_v5  ;;  %1146 = vmatmul.msk.f32.vlgmr.msra.gmra.mxu3 %vm375_vm8, %v1144_v5 }
 0x11f   : > { %959 = vmatpush.msra.mxu0 %v937_v9  ;;  %1150 = vmatmul.msk.f32.vlgmr.msrb.gmra.mxu1 %vm375_vm8, %v1148_v8 }
 0x120   : > { %1149 = vmatmul.msk.f32.vlgmr.msrb.gmra.mxu0 %vm375_vm8, %v1148_v8  ;;  %v1213_v10 = vpop.permute.xlu0 %1212 }
 0x121   : > { %v1215_v11 = vunpack.i.h.bf16 %v1213_v10  ;;  %v1214_v12 = vunpack.i.l.bf16 %v1213_v10  ;;  %v860_v13 = vpop.permute.xlu1 %859 }
 0x123   : > { %v861_v15 = vsel %vm351_vm0, %v1214_v12, %v1215_v11  ;;  %v862_v16 = vsel %vm351_vm0, %v1215_v11, %v860_v13 }
 0x124   : > { %883 = vmatpush.msrb.mxu2 %v861_v15  ;;  %903 = vmatpush.msrb.mxu3 %v862_v16 }
 0x126   : > { %1153 = vmatmul.msk.f32.vlgmr.msrb.gmra.mxu2 %vm375_vm8, %v1152_v14  ;;  %1154 = vmatmul.msk.f32.vlgmr.msrb.gmra.mxu3 %vm375_vm8, %v1152_v14 }
 0x128   : > { %1157 = vmatmul.msk.f32.vlgmr.msra.gmra.mxu0 %vm375_vm8, %v1156_v17  ;;  %v936_v18 = vpop.permute.xlu0 %935 }
 0x129   : > { %v938_v19 = vsel %vm333_vm1, %v1220_v62, %v936_v18 }
 0x12a   : > { %979 = vmatpush.msra.mxu1 %v938_v19 }
 0x12b   : > { %1158 = vmatmul.msk.f32.vlgmr.msra.gmra.mxu1 %vm375_vm8, %v1156_v17 }
 0x171   : > { %v453_v24 = vpop.f32.mrf.mxu2 }
 0x182   : > { %v396_v20 = vpop.f32.mrf.mxu0  ;;  %v416_v21 = vpop.f32.mrf.mxu1 }
 0x183   : > { %v454_v28 = vadd.f32 %v453_v24, %v396_v20 }
 0x18b   : > { %v529_v22 = vpop.f32.mrf.mxu0  ;;  %v549_v23 = vpop.f32.mrf.mxu1 }
 0x18c   : > { %v552_v32 = vadd.f32 %v529_v22, %v454_v28 }
 0x18e   : > { %v473_v25 = vpop.f32.mrf.mxu3 }
 0x18f   : > { %v474_v29 = vadd.f32 %v473_v25, %v416_v21 }
 0x191   : > { %v553_v33 = vadd.f32 %v549_v23, %v474_v29 }
 0x193   : > { %v654_v26 = vpop.f32.mrf.mxu0 }
 0x194   : > { %v674_v27 = vpop.f32.mrf.mxu1 }
 0x198   : > { %v607_v30 = vpop.f32.mrf.mxu2  ;;  %v627_v31 = vpop.f32.mrf.mxu3 }
 0x199   : > { %v630_v34 = vadd.f32 %v607_v30, %v552_v32  ;;  %v631_v35 = vadd.f32 %v627_v31, %v553_v33 }
 0x19b   : > { %v677_v42 = vadd.f32 %v654_v26, %v630_v34  ;;  %v678_v43 = vadd.f32 %v674_v27, %v631_v35 }
 0x19c   : > { %v829_v39 = vpop.f32.mrf.mxu1 }
 0x19d   : > { %v809_v38 = vpop.f32.mrf.mxu0 }
 0x1a1   : > { %v733_v40 = vpop.f32.mrf.mxu2  ;;  %v753_v41 = vpop.f32.mrf.mxu3 }
 0x1a2   : > { %v756_v44 = vadd.f32 %v733_v40, %v677_v42  ;;  %v757_v45 = vadd.f32 %v753_v41, %v678_v43 }
 0x1a4   : > { %v832_v46 = vadd.f32 %v809_v38, %v756_v44  ;;  %v833_v47 = vadd.f32 %v829_v39, %v757_v45 }
 0x1a5   : > { %v961_v48 = vpop.f32.mrf.mxu0 }
 0x1a8   : > { %v981_v53 = vpop.f32.mrf.mxu1 }
 0x1a9   : > { %v885_v49 = vpop.f32.mrf.mxu2  ;;  %v905_v50 = vpop.f32.mrf.mxu3 }
 0x1aa   : > { %v908_v51 = vadd.f32 %v885_v49, %v832_v46  ;;  %v909_v52 = vadd.f32 %v905_v50, %v833_v47 }
 0x1ac   : > { %v984_v54 = vadd.f32 %v961_v48, %v908_v51  ;;  %v985_v55 = vadd.f32 %v981_v53, %v909_v52 }
 0x1ae   : > { %986 = vst [vmem:[%s291_s16] sm:$0xff] %v984_v54  ;;  %v988_v56 = vadd.f32 %v985_v55, %v984_v54  ;;  %v992_v57 = vmul.f32 %v984_v54, %v984_v54  ;;  %v993_v58 = vmul.f32 %v985_v55, %v985_v55 }
 0x1af   : > { %987 = vst [vmem:[%s291_s16 + $0x8] sm:$0xff] %v985_v55 }
 0x1b0   : > { %989 = vadd.xlane.f32.xlu1 %v988_v56  ;;  %v994_v59 = vadd.f32 %v993_v58, %v992_v57 }
 0x1b2   : > { %995 = vadd.xlane.f32.xlu2 %v994_v59 }
 0x223   : > { %v990_v36 = vpop.xlane.xlu1 %989 }
 0x224   : > { %991 = vst.msk [vmem:[%s295_s18] sm:$0xff] %vm582_vm4, %v990_v36 }
 0x225   : > { %v996_v37 = vpop.xlane.xlu2 %995 }
 0x226   : > { %997 = vst.msk [vmem:[%s299_s12] sm:$0xff] %vm582_vm4, %v996_v37 }
 0x227 PF: > { %s18_s24 = sadd.s32 1, %s1227_s24  }
 0x228   : > { %p15_p4 = scmp.ge.s32.totalorder %s18_s24, 4  }
 0x22a   :  { %17 = sbr.rel (!%p15_p4) target bundleno = 1 (0x1), region = 109 }

// kernel: convolution_block_forward.3
= control target key start
LH: loop header
LB: loop body
LE: loop exit
PB: predicated region body
PF: predicated region fallthrough
CT: control target
= control target key end

     0   :  { %s1326_s24 = smov 0   ;;  %s1536_s0 = inlined_call_operand.vmem [shape: f32[2,4,256], index: 0, kind: input, shape index: {}]   ;;  %s1537_s1 = inlined_call_operand.vmem [shape: f32[9,8,4], index: 1, kind: input, shape index: {}]   ;;  %s1538_s2 = inlined_call_operand.vmem [shape: f32[9,1,256], index: 2, kind: input, shape index: {}]   ;;  %s1539_s3 = inlined_call_operand.vmem [shape: f32[4,1], index: 3, kind: input, shape index: {}]   ;;  %s1540_s4 = inlined_call_operand.vmem [shape: f32[4,1], index: 4, kind: input, shape index: {}]   ;;  %s1541_s5 = inlined_call_operand.vmem [shape: f32[2,8,256], index: 5, kind: output, shape index: {0}]   ;;  %s1542_s6 = inlined_call_operand.vmem [shape: f32[2,8,1], index: 6, kind: output, shape index: {1}]   ;;  %s1543_s7 = inlined_call_operand.vmem [shape: f32[2,8,1], index: 7, kind: output, shape index: {2}]  }
   0x1 LB: > { %s1183_s25 = sadd.s32 4294967295, %s1274_s24   ;;  %p1187_p0 = scmp.ge.s32.totalorder %s1274_s24, 1  ;;  %s1274_s24 = sphi %s1326_s24, %s18_s24  }
   0x2   : > { %p242_p1 = scmp.lt.s32.totalorder %s1274_s24, 3 }
   0x4   : > { %p243_p2 = pnand %p1187_p0, %p242_p1 }
   0x5   : > { %s1277_s13 = smov (!%p243_p2), 112   ;;  %s1278_s20 = smov (!%p243_p2), 113  }
   0x6   : > { %246 = sbr.rel (%p243_p2) target bundleno = 589 (0x24d), region = 40  ;;  %s1279_s27 = smov (!%p243_p2), 111  }
   0x7   : > { %s1280_s28 = smov (!%p243_p2), 1   ;;  %s1281_s29 = smov (!%p243_p2), 127  }
   0x8   : > { %s1282_s30 = smov (!%p243_p2), 15   ;;  %s1283_s8 = smov (!%p243_p2), 17  }
   0x9   : > { %s1284_s9 = smov (!%p243_p2), 16   ;;  %p282_p3 = scmp.lt.s32.totalorder (!%p243_p2), %s1183_s25, 1 }
   0xb   : > { %v301_v0 = vld [vmem:[%s1539_s3] sm:$0xf]  ;;  %v1276_v2 = vmov 0   ;;  %vm332_vm0 = vcmask 1043456   ;;  %v1221_v8 = vld [vmem:[%s1538_s2 + $0xa] sm:$0x3] }
   0xc   : > { %v1194_v1 = vld [vmem:[%s1538_s2 + $0x2] sm:$0x3]  ;;  %1267 = vset.pattern.permute.xlu0 %v1276_v2  ;;  %v327_v5 = vld [vmem:[%s1538_s2] sm:$0x3]  ;;  %v1204_v10 = vld [vmem:[%s1538_s2 + $0x4] sm:$0x3] }
   0xd   : > { %v347_v3 = vperm.slane %v1194_v1, 0  ;;  %v348_v4 = vperm.slane %v1194_v1, 1  ;;  %304 = vperm.xlu0 %1267, %v301_v0   ;;  %v330_v7 = vperm.slane %v327_v5, 1  ;;  %v496_v11 = vperm.slane %v1204_v10, 0  ;;  %v1210_v13 = vld [vmem:[%s1538_s2 + $0x6] sm:$0x3] }
   0xe   : > { %v497_v12 = vperm.slane %v1204_v10, 1  ;;  %v312_v14 = vld [vmem:[%s1540_s4] sm:$0xf]  ;;  %v329_v15 = vperm.slane %v327_v5, 0  ;;  %v724_v17 = vperm.slane %v1221_v8, 1  ;;  %v583_v20 = vperm.slane %v1210_v13, 1 }
   0xf   : > { %v349_v6 = vrot.slane %v348_v4, 4  ;;  %v331_v16 = vrot.slane %v330_v7, 4  ;;  %v1227_v18 = vld [vmem:[%s1538_s2 + $0xc] sm:$0x3]  ;;  %v723_v23 = vperm.slane %v1221_v8, 0  ;;  %v582_v27 = vperm.slane %v1210_v13, 0 }
  0x10   : > { %v498_v19 = vrot.slane %v497_v12, 4  ;;  %v725_v24 = vrot.slane %v724_v17, 4  ;;  %v808_v25 = vperm.slane %v1227_v18, 1  ;;  %v1239_v26 = vld [vmem:[%s1538_s2 + $0x10] sm:$0x3]  ;;  %v584_v28 = vrot.slane %v583_v20, 4 }
  0x11   : > { %v350_v9 = vsel %vm332_vm0, %v347_v3, %v349_v6  ;;  %v333_v22 = vsel %vm332_vm0, %v329_v15, %v331_v16  ;;  %v1233_v29 = vld [vmem:[%s1538_s2 + $0xe] sm:$0x3]  ;;  %v807_v31 = vperm.slane %v1227_v18, 0  ;;  %v976_v33 = vperm.slane %v1239_v26, 1  ;;  %s1545_s25 = smov (!%p282_p3, %s1183_s25), 1 }
  0x12   : > { %351 = vrot.lane.b32.xlu1 %v350_v9, %s1277_s13  ;;  %v499_v21 = vsel %vm332_vm0, %v496_v11, %v498_v19  ;;  %v726_v30 = vsel %vm332_vm0, %v723_v23, %v725_v24  ;;  %v809_v32 = vrot.slane %v808_v25, 4  ;;  %v585_v34 = vsel %vm332_vm0, %v582_v27, %v584_v28  ;;  %s1387_s10 = sshll.u32 %s1545_s25, 3  ;;  %s1248_s12 = sshll.u32 %s1545_s25, 4 }
  0x13   : > { %500 = vrot.lane.b32.xlu2 %v499_v21, %s1278_s20  ;;  %v892_v35 = vperm.slane %v1233_v29, 1  ;;  %v975_v37 = vperm.slane %v1239_v26, 0  ;;  %v977_v38 = vrot.slane %v976_v33, 4  ;;  %v891_v39 = vperm.slane %v1233_v29, 0  ;;  %s286_s14 = scalar_lea.vmem %s1536_s0, %s1387_s10  ;;  %s291_s16 = scalar_lea.vmem %s1541_s5, %s1248_s12 }
  0x14   : > { %v810_v36 = vsel %vm332_vm0, %v807_v31, %v809_v32  ;;  %v1285_v43 = vmov 839922192   ;;  %v300_v48 = vld [vmem:[%s286_s14] sm:$0xff]  ;;  %vm354_vm1 = vcmask 916480   ;;  %vm337_vm2 = vcmask 908288   ;;  %s295_s17 = scalar_lea.vmem %s1542_s6, %s1387_s10 }
  0x15   : > { %315 = vperm.xlu0 %1267, %v312_v14   ;;  %v893_v40 = vrot.slane %v892_v35, 4  ;;  %v978_v41 = vsel %vm332_vm0, %v975_v37, %v977_v38  ;;  %v307_v44 = vunpack.c.l.s4 %v1285_v43  ;;  %vm503_vm3 = vcmask 924672  }
  0x16   : > { %vm589_vm4 = vcmask 1039360   ;;  %vm611_vm5 = vcmask 7168   ;;  %vm525_vm6 = vcmask 121856   ;;  %vm376_vm7 = vcmask 130048  }
  0x17   : > { %v894_v42 = vsel %vm332_vm0, %v891_v39, %v893_v40  ;;  %v308_v46 = vunpack.c.0.s8 %v307_v44  ;;  %vm441_vm8 = vcmask 138240   ;;  %vm379_vm9 = vcmask 31744  }
  0x1a   : > { %334 = vrot.lane.b32.xlu1 %v333_v22, %s1279_s27 }
  0x1b   : > { %586 = vrot.lane.b32.xlu2 %v585_v34, %s1281_s29 }
  0x1d   : > { %727 = vrot.lane.b32.xlu0 %v726_v30, %s1280_s28 }
  0x22   : > { %811 = vrot.lane.b32.xlu1 %v810_v36, %s1282_s30 }
  0x23   : > { %895 = vrot.lane.b32.xlu2 %v894_v42, %s1284_s9 }
  0x25   : > { %979 = vrot.lane.b32.xlu0 %v978_v41, %s1283_s8 }
  0x6d   : > { %v501_v62 = vpop.permute.xlu2 %500 }
  0x6e   : > { %v502_v0 = vrot.slane %v501_v62, 4 }
  0x70   : > { %v504_v6 = vsel %vm503_vm3, %v502_v0, %v501_v62 }
  0x75   : > { %v587_v8 = vpop.permute.xlu2 %586 }
  0x76   : > { %v588_v10 = vrot.slane %v587_v8, 4 }
  0x78   : > { %v590_v15 = vsel %vm589_vm4, %v588_v10, %v587_v8 }
  0x7d   : > { %v896_v38 = vpop.permute.xlu2 %895 }
  0x7e   : > { %v897_v41 = vrot.slane %v896_v38, 4 }
  0x7f   : > { %v305_v45 = vpop.permute.xlu0 %304 }
  0x80   : > { %v309_v47 = vperm.slane %v305_v45, %v308_v46 }
  0x82   : > { %v311_v50 = vmul.f32 %v309_v47, %v300_v48  ;;  %v898_v48 = vsel %vm376_vm7, %v897_v41, %v896_v38  ;;  %v1234_v38 = vld [vmem:[%s1537_s1 + $0x38] sm:$0xff] }
  0x84   : > { %v352_v53 = vpop.permute.xlu1 %351 }
  0x85   : > { %v353_v54 = vrot.slane %v352_v53, 4 }
  0x87   : > { %v316_v49 = vpop.permute.xlu0 %315  ;;  %v355_v57 = vsel %vm354_vm1, %v353_v54, %v352_v53 }
  0x88   : > { %v320_v51 = vperm.slane %v316_v49, %v308_v46 }
  0x8a   : > { %v1393_v52 = vadd.f32 %v320_v51, %v311_v50 }
  0x8c   : > { %323 = vst [vmem:[#allocation2] sm:$0xff] %v1393_v52  ;;  %v335_v58 = vpop.permute.xlu1 %334  ;;  %v901_v50 = vmul.f32 %v898_v48, %v1393_v52 }
  0x8d   : > { %324 = vst [vmem:[#allocation2 + $0x8] sm:$0xff] %v1393_v52  ;;  %v336_v61 = vrot.slane %v335_v58, 4 }
  0x8f   : > { %v338_v63 = vsel %vm337_vm2, %v336_v61, %v335_v58  ;;  %v728_v22 = vpop.permute.xlu0 %727 }
  0x90   : > { %v729_v24 = vrot.slane %v728_v22, 4 }
  0x92   : > { %v730_v30 = vsel %vm611_vm5, %v729_v24, %v728_v22 }
  0x93   : > { %v733_v32 = vmul.f32 %v730_v30, %v1393_v52 }
  0x94   : > { %v491_v55 = vld [vmem:[#allocation2 + $0x4] sm:$0xff]  ;;  %v326_v56 = vld [vmem:[#allocation2 + $0xc] sm:$0xf]  ;;  %v812_v28 = vpop.permute.xlu1 %811 }
  0x95   : > { %v358_v59 = vmul.f32 %v491_v55, %v355_v57  ;;  %v359_v60 = vmul.f32 %v353_v54, %v326_v56  ;;  %v341_v1 = vmul.f32 %v491_v55, %v338_v63  ;;  %v342_v2 = vmul.f32 %v336_v61, %v326_v56  ;;  %v492_v7 = vld [vmem:[#allocation2 + $0xc] sm:$0xf]  ;;  %v719_v23 = vld [vmem:[#allocation2 + $0x8] sm:$0xf] }
  0x96   : > { %v507_v9 = vmul.f32 %v504_v6, %v491_v55  ;;  %v508_v11 = vmul.f32 %v502_v0, %v492_v7  ;;  %v578_v16 = vld [vmem:[#allocation2 + $0xc] sm:$0xf]  ;;  %v593_v17 = vmul.f32 %v590_v15, %v491_v55  ;;  %v734_v25 = vmul.f32 %v729_v24, %v719_v23  ;;  %v803_v33 = vld [vmem:[#allocation2 + $0x8] sm:$0xf]  ;;  %v1216_v23 = vld [vmem:[%s1537_s1 + $0x20] sm:$0xff] }
  0x97   : > { %364 = vst [vmem:[#allocation1] ss:$2 sm:$0xff] %v358_v59  ;;  %v594_v18 = vmul.f32 %v588_v10, %v578_v16  ;;  %v813_v31 = vrot.slane %v812_v28, 4  ;;  %v887_v40 = vld [vmem:[#allocation2 + $0x8] sm:$0xf]  ;;  %v980_v46 = vpop.permute.xlu0 %979  ;;  %v343_v10 = vld [vmem:[%s1537_s1] sm:$0xff] }
  0x98   : > { %366 = vst [vmem:[#allocation1 + $0x10] ss:$2 sm:$0xff] %v359_v60  ;;  %v902_v43 = vmul.f32 %v897_v41, %v887_v40  ;;  %v981_v49 = vrot.slane %v980_v46, 4  ;;  %v971_v51 = vld [vmem:[#allocation2 + $0x8] sm:$0xf] }
  0x99   : > { %v818_v34 = vmul.f32 %v813_v31, %v803_v33  ;;  %v814_v39 = vsel %vm525_vm6, %v813_v31, %v812_v28  ;;  %v1205_v16 = vld [vmem:[%s1537_s1 + $0x10] sm:$0xff] }
  0x9a   : > { %v817_v42 = vmul.f32 %v814_v39, %v1393_v52  ;;  %v986_v53 = vmul.f32 %v981_v49, %v971_v51  ;;  %v982_v57 = vsel %vm441_vm8, %v981_v49, %v980_v46 }
  0x9b   : > { %v985_v58 = vmul.f32 %v982_v57, %v1393_v52 }
  0x9e   : > { %v367_v3 = vld.sshfl [vmem:[#allocation1] sm:$0xff pattern:$0x75316420]  ;;  %v368_v4 = vld.sshfl [vmem:[#allocation1 + $0x8] sm:$0xff pattern:$0x75316420] }
  0x9f   : > { %v369_v5 = vld.sshfl [vmem:[#allocation1 + $0x10] sm:$0xff pattern:$0x75316420]  ;;  %429 = vst [vmem:[#allocation1] ss:$2 sm:$0xff] %v341_v1  ;;  %372 = vrot.lane.b32.xlu2 %v368_v4, %s1284_s9  ;;  %370 = vrot.lane.b32.xlu1 %v367_v3, %s1284_s9 }
  0xa0   : > { %431 = vst [vmem:[#allocation1 + $0x10] ss:$2 sm:$0xff] %v342_v2  ;;  %374 = vrot.lane.b32.xlu0 %v369_v5, %s1284_s9 }
  0xa6   : > { %v433_v12 = vld.sshfl [vmem:[#allocation1 + $0x8] sm:$0xff pattern:$0x75316420]  ;;  %v432_v13 = vld.sshfl [vmem:[#allocation1] sm:$0xff pattern:$0x75316420] }
  0xa7   : > { %v434_v14 = vld.sshfl [vmem:[#allocation1 + $0x10] sm:$0xff pattern:$0x75316420]  ;;  %437 = vrot.lane.b32.xlu2 %v433_v12, %s1283_s8  ;;  %435 = vrot.lane.b32.xlu1 %v432_v13, %s1283_s8  ;;  %513 = vst [vmem:[#allocation1] ss:$2 sm:$0xff] %v507_v9 }
  0xa8   : > { %439 = vrot.lane.b32.xlu0 %v434_v14, %s1283_s8  ;;  %515 = vst [vmem:[#allocation1 + $0x10] ss:$2 sm:$0xff] %v508_v11 }
  0xae   : > { %v517_v19 = vld.sshfl [vmem:[#allocation1 + $0x8] sm:$0xff pattern:$0x75316420]  ;;  %v516_v20 = vld.sshfl [vmem:[#allocation1] sm:$0xff pattern:$0x75316420] }
  0xaf   : > { %v518_v21 = vld.sshfl [vmem:[#allocation1 + $0x10] sm:$0xff pattern:$0x75316420]  ;;  %521 = vrot.lane.b32.xlu2 %v517_v19, %s1282_s30  ;;  %519 = vrot.lane.b32.xlu1 %v516_v20, %s1282_s30  ;;  %599 = vst [vmem:[#allocation1] ss:$2 sm:$0xff] %v593_v17 }
  0xb0   : > { %523 = vrot.lane.b32.xlu0 %v518_v21, %s1282_s30  ;;  %601 = vst [vmem:[#allocation1 + $0x10] ss:$2 sm:$0xff] %v594_v18  ;;  %v1211_v21 = vld [vmem:[%s1537_s1 + $0x18] sm:$0xff] }
  0xb6   : > { %v603_v26 = vld.sshfl [vmem:[#allocation1 + $0x8] sm:$0xff pattern:$0x75316420]  ;;  %v602_v27 = vld.sshfl [vmem:[#allocation1] sm:$0xff pattern:$0x75316420] }
  0xb7   : > { %v604_v29 = vld.sshfl [vmem:[#allocation1 + $0x10] sm:$0xff pattern:$0x75316420]  ;;  %607 = vrot.lane.b32.xlu2 %v603_v26, %s1280_s28  ;;  %605 = vrot.lane.b32.xlu1 %v602_v27, %s1280_s28  ;;  %666 = vst [vmem:[#allocation1] ss:$2 sm:$0xff] %v1393_v52  ;;  %v1195_v52 = vld [vmem:[%s1537_s1 + $0x8] sm:$0xff] }
  0xb8   : > { %609 = vrot.lane.b32.xlu0 %v604_v29, %s1280_s28  ;;  %741 = vst [vmem:[#allocation1 + $0x10] ss:$2 sm:$0xff] %v734_v25  ;;  %v1222_v26 = vld [vmem:[%s1537_s1 + $0x28] sm:$0xff] }
  0xbe   : > { %v1416_v35 = vld.sshfl [vmem:[#allocation1] sm:$0xff pattern:$0x75316420]  ;;  %v1418_v36 = vld.sshfl [vmem:[#allocation1 + $0x8] sm:$0xff pattern:$0x75316420] }
  0xbf   : > { %739 = vst [vmem:[#allocation1] ss:$2 sm:$0xff] %v733_v32  ;;  %v744_v37 = vld.sshfl [vmem:[#allocation1 + $0x10] sm:$0xff pattern:$0x75316420] }
  0xc0   : > { %749 = vrot.lane.b32.xlu0 %v744_v37, %s1281_s29  ;;  %825 = vst [vmem:[#allocation1 + $0x10] ss:$2 sm:$0xff] %v818_v34  ;;  %v1228_v32 = vld [vmem:[%s1537_s1 + $0x30] sm:$0xff] }
  0xc6   : > { %v743_v44 = vld.sshfl [vmem:[#allocation1 + $0x8] sm:$0xff pattern:$0x75316420]  ;;  %v742_v45 = vld.sshfl [vmem:[#allocation1] sm:$0xff pattern:$0x75316420] }
  0xc7   : > { %v828_v47 = vld.sshfl [vmem:[#allocation1 + $0x10] sm:$0xff pattern:$0x75316420]  ;;  %747 = vrot.lane.b32.xlu2 %v743_v44, %s1281_s29  ;;  %745 = vrot.lane.b32.xlu1 %v742_v45, %s1281_s29  ;;  %823 = vst [vmem:[#allocation1] ss:$2 sm:$0xff] %v817_v42  ;;  %v1240_v44 = vld [vmem:[%s1537_s1 + $0x40] sm:$0xff] }
  0xc8   : > { %833 = vrot.lane.b32.xlu0 %v828_v47, %s1278_s20  ;;  %909 = vst [vmem:[#allocation1 + $0x10] ss:$2 sm:$0xff] %v902_v43 }
  0xce   : > { %v827_v54 = vld.sshfl [vmem:[#allocation1 + $0x8] sm:$0xff pattern:$0x75316420]  ;;  %v826_v55 = vld.sshfl [vmem:[#allocation1] sm:$0xff pattern:$0x75316420] }
  0xcf   : > { %v912_v56 = vld.sshfl [vmem:[#allocation1 + $0x10] sm:$0xff pattern:$0x75316420]  ;;  %831 = vrot.lane.b32.xlu2 %v827_v54, %s1278_s20  ;;  %829 = vrot.lane.b32.xlu1 %v826_v55, %s1278_s20  ;;  %907 = vst [vmem:[#allocation1] ss:$2 sm:$0xff] %v901_v50  ;;  %s299_s20 = scalar_lea.vmem %s1543_s7, %s1387_s10 }
  0xd0   : > { %917 = vrot.lane.b32.xlu0 %v912_v56, %s1277_s13  ;;  %993 = vst [vmem:[#allocation1 + $0x10] ss:$2 sm:$0xff] %v986_v53 }
  0xd6   : > { %v911_v59 = vld.sshfl [vmem:[#allocation1 + $0x8] sm:$0xff pattern:$0x75316420]  ;;  %v910_v60 = vld.sshfl [vmem:[#allocation1] sm:$0xff pattern:$0x75316420] }
  0xd7   : > { %v996_v61 = vld.sshfl [vmem:[#allocation1 + $0x10] sm:$0xff pattern:$0x75316420]  ;;  %915 = vrot.lane.b32.xlu2 %v911_v59, %s1277_s13  ;;  %913 = vrot.lane.b32.xlu1 %v910_v60, %s1277_s13  ;;  %991 = vst [vmem:[#allocation1] ss:$2 sm:$0xff] %v985_v58 }
  0xd8   : > { %1001 = vrot.lane.b32.xlu0 %v996_v61, %s1279_s27 }
  0xde   : > { %v995_v62 = vld.sshfl [vmem:[#allocation1 + $0x8] sm:$0xff pattern:$0x75316420]  ;;  %v994_v63 = vld.sshfl [vmem:[#allocation1] sm:$0xff pattern:$0x75316420] }
  0xdf   : > { %999 = vrot.lane.b32.xlu2 %v995_v62, %s1279_s27  ;;  %997 = vrot.lane.b32.xlu1 %v994_v63, %s1279_s27 }
  0xf9   : > { %v373_v0 = vpop.permute.xlu2 %372 }
 0x101   : > { %v438_v1 = vpop.permute.xlu2 %437 }
 0x109   : > { %v522_v7 = vpop.permute.xlu2 %521 }
 0x111   : > { %v371_v2 = vpop.permute.xlu1 %370  ;;  %v608_v17 = vpop.permute.xlu2 %607 }
 0x112   : > { %v375_v3 = vpop.permute.xlu0 %374  ;;  %v377_v4 = vsel %vm376_vm7, %v371_v2, %v373_v0 }
 0x113   : > { %1196 = vmatpush.msk.msra.mxu0 %vm332_vm0, %v377_v4  ;;  %v378_v5 = vsel %vm376_vm7, %v373_v0, %v375_v3 }
 0x114   : > { %1198 = vmatpush.msk.msra.mxu1 %vm332_vm0, %v378_v5  ;;  %1197 = vmatmul.msk.f32.vlgmr.msra.gmra.mxu0 %vm379_vm9, %v1195_v52 }
 0x115   : > { %1199 = vmatmul.msk.f32.vlgmr.msra.gmra.mxu1 %vm379_vm9, %v1195_v52 }
 0x119   : > { %v436_v6 = vpop.permute.xlu1 %435 }
 0x11a   : > { %v440_v8 = vpop.permute.xlu0 %439  ;;  %v442_v9 = vsel %vm441_vm8, %v436_v6, %v438_v1 }
 0x11b   : > { %1200 = vmatpush.msk.msra.mxu2 %vm332_vm0, %v442_v9  ;;  %v443_v11 = vsel %vm441_vm8, %v438_v1, %v440_v8 }
 0x11c   : > { %1202 = vmatpush.msk.msra.mxu3 %vm332_vm0, %v443_v11  ;;  %1201 = vmatmul.msk.f32.vlgmr.msra.gmra.mxu2 %vm379_vm9, %v343_v10 }
 0x11d   : > { %1203 = vmatmul.msk.f32.vlgmr.msra.gmra.mxu3 %vm379_vm9, %v343_v10 }
 0x121   : > { %v520_v12 = vpop.permute.xlu1 %519  ;;  %v748_v24 = vpop.permute.xlu2 %747 }
 0x122   : > { %v524_v13 = vpop.permute.xlu0 %523  ;;  %v526_v14 = vsel %vm525_vm6, %v520_v12, %v522_v7 }
 0x123   : > { %1206 = vmatpush.msk.msrb.mxu0 %vm332_vm0, %v526_v14  ;;  %v527_v15 = vsel %vm525_vm6, %v522_v7, %v524_v13 }
 0x124   : > { %1208 = vmatpush.msk.msrb.mxu1 %vm332_vm0, %v527_v15  ;;  %1207 = vmatmul.msk.f32.vlgmr.msrb.gmra.mxu0 %vm379_vm9, %v1205_v16 }
 0x125   : > { %1217 = vmatpush.msk.msra.mxu0 %vm332_vm0, %v1416_v35  ;;  %1209 = vmatmul.msk.f32.vlgmr.msrb.gmra.mxu1 %vm379_vm9, %v1205_v16 }
 0x126   : > { %1219 = vmatpush.msk.msra.mxu1 %vm332_vm0, %v1418_v36 }
 0x129   : > { %v606_v18 = vpop.permute.xlu1 %605  ;;  %v832_v28 = vpop.permute.xlu2 %831 }
 0x12a   : > { %v610_v19 = vpop.permute.xlu0 %609  ;;  %v612_v20 = vsel %vm611_vm5, %v606_v18, %v608_v17 }
 0x12b   : > { %1212 = vmatpush.msk.msrb.mxu2 %vm332_vm0, %v612_v20  ;;  %v613_v22 = vsel %vm611_vm5, %v608_v17, %v610_v19 }
 0x12c   : > { %1214 = vmatpush.msk.msrb.mxu3 %vm332_vm0, %v613_v22  ;;  %1213 = vmatmul.msk.f32.vlgmr.msrb.gmra.mxu2 %vm379_vm9, %v1211_v21 }
 0x12d   : > { %1215 = vmatmul.msk.f32.vlgmr.msrb.gmra.mxu3 %vm379_vm9, %v1211_v21  ;;  %1218 = vmatmul.msk.f32.vlgmr.msra.gmra.mxu0 %vm379_vm9, %v1216_v23 }
 0x12e   : > { %1220 = vmatmul.msk.f32.vlgmr.msra.gmra.mxu1 %vm379_vm9, %v1216_v23 }
 0x131   : > { %v916_v34 = vpop.permute.xlu2 %915 }
 0x132   : > { %v750_v25 = vpop.permute.xlu0 %749 }
 0x133   : > { %v752_v27 = vsel %vm589_vm4, %v748_v24, %v750_v25 }
 0x134   : > { %1225 = vmatpush.msk.msra.mxu3 %vm332_vm0, %v752_v27 }
 0x135   : > { %1226 = vmatmul.msk.f32.vlgmr.msra.gmra.mxu3 %vm379_vm9, %v1222_v26 }
 0x139   : > { %v746_v29 = vpop.permute.xlu1 %745  ;;  %v1000_v41 = vpop.permute.xlu2 %999 }
 0x13a   : > { %v834_v30 = vpop.permute.xlu0 %833  ;;  %v751_v31 = vsel %vm589_vm4, %v746_v29, %v748_v24 }
 0x13b   : > { %v836_v33 = vsel %vm503_vm3, %v832_v28, %v834_v30  ;;  %1223 = vmatpush.msk.msra.mxu2 %vm332_vm0, %v751_v31 }
 0x13c   : > { %1231 = vmatpush.msk.msrb.mxu1 %vm332_vm0, %v836_v33  ;;  %1224 = vmatmul.msk.f32.vlgmr.msra.gmra.mxu2 %vm379_vm9, %v1222_v26 }
 0x13d   : > { %1232 = vmatmul.msk.f32.vlgmr.msrb.gmra.mxu1 %vm379_vm9, %v1228_v32 }
 0x141   : > { %v830_v35 = vpop.permute.xlu1 %829 }
 0x142   : > { %v918_v36 = vpop.permute.xlu0 %917  ;;  %v835_v37 = vsel %vm503_vm3, %v830_v35, %v832_v28 }
 0x143   : > { %v920_v39 = vsel %vm354_vm1, %v916_v34, %v918_v36  ;;  %1229 = vmatpush.msk.msrb.mxu0 %vm332_vm0, %v835_v37 }
 0x144   : > { %1237 = vmatpush.msk.msrb.mxu3 %vm332_vm0, %v920_v39  ;;  %1230 = vmatmul.msk.f32.vlgmr.msrb.gmra.mxu0 %vm379_vm9, %v1228_v32 }
 0x145   : > { %1238 = vmatmul.msk.f32.vlgmr.msrb.gmra.mxu3 %vm379_vm9, %v1234_v38 }
 0x149   : > { %v914_v40 = vpop.permute.xlu1 %913 }
 0x14a   : > { %v1002_v42 = vpop.permute.xlu0 %1001  ;;  %v919_v43 = vsel %vm354_vm1, %v914_v40, %v916_v34 }
 0x14b   : > { %v1004_v45 = vsel %vm337_vm2, %v1000_v41, %v1002_v42  ;;  %1235 = vmatpush.msk.msrb.mxu2 %vm332_vm0, %v919_v43 }
 0x14c   : > { %1243 = vmatpush.msk.msra.mxu1 %vm332_vm0, %v1004_v45  ;;  %1236 = vmatmul.msk.f32.vlgmr.msrb.gmra.mxu2 %vm379_vm9, %v1234_v38 }
 0x14d   : > { %1244 = vmatmul.msk.f32.vlgmr.msra.gmra.mxu1 %vm379_vm9, %v1240_v44 }
 0x151   : > { %v998_v46 = vpop.permute.xlu1 %997 }
 0x152   : > { %v1003_v47 = vsel %vm337_vm2, %v998_v46, %v1000_v41 }
 0x153   : > { %1241 = vmatpush.msk.msra.mxu0 %vm332_vm0, %v1003_v47 }
 0x154   : > { %1242 = vmatmul.msk.f32.vlgmr.msra.gmra.mxu0 %vm379_vm9, %v1240_v44 }
 0x191   : > { %v404_v50 = vpop.f32.mrf.mxu0 }
 0x192   : > { %v424_v48 = vpop.f32.mrf.mxu1 }
 0x19f   : > { %v468_v54 = vpop.f32.mrf.mxu2 }
 0x1a0   : > { %v488_v49 = vpop.f32.mrf.mxu3  ;;  %v469_v60 = vadd.f32 %v468_v54, %v404_v50 }
 0x1a1   : > { %v489_v53 = vadd.f32 %v488_v49, %v424_v48  ;;  %v552_v57 = vpop.f32.mrf.mxu0 }
 0x1a2   : > { %v572_v51 = vpop.f32.mrf.mxu1  ;;  %v575_v63 = vadd.f32 %v552_v57, %v469_v60 }
 0x1a3   : > { %v576_v56 = vadd.f32 %v572_v51, %v489_v53 }
 0x1aa   : > { %v693_v1 = vpop.f32.mrf.mxu0 }
 0x1ab   : > { %v713_v58 = vpop.f32.mrf.mxu1 }
 0x1af   : > { %v638_v61 = vpop.f32.mrf.mxu2 }
 0x1b0   : > { %v658_v55 = vpop.f32.mrf.mxu3  ;;  %v661_v3 = vadd.f32 %v638_v61, %v575_v63 }
 0x1b1   : > { %v662_v59 = vadd.f32 %v658_v55, %v576_v56 }
 0x1b2   : > { %v716_v6 = vadd.f32 %v693_v1, %v661_v3 }
 0x1b3   : > { %v717_v62 = vadd.f32 %v713_v58, %v662_v59 }
 0x1b8   : > { %v797_v0 = vpop.f32.mrf.mxu3 }
 0x1b9   : > { %v801_v52 = vadd.f32 %v797_v0, %v717_v62 }
 0x1ba   : > { %v881_v2 = vpop.f32.mrf.mxu1 }
 0x1bb   : > { %v885_v5 = vadd.f32 %v881_v2, %v801_v52 }
 0x1bf   : > { %v777_v4 = vpop.f32.mrf.mxu2 }
 0x1c0   : > { %v800_v10 = vadd.f32 %v777_v4, %v716_v6 }
 0x1c1   : > { %v861_v8 = vpop.f32.mrf.mxu0 }
 0x1c2   : > { %v884_v13 = vadd.f32 %v861_v8, %v800_v10 }
 0x1c8   : > { %v965_v7 = vpop.f32.mrf.mxu3 }
 0x1c9   : > { %v969_v9 = vadd.f32 %v965_v7, %v885_v5 }
 0x1ca   : > { %v1049_v11 = vpop.f32.mrf.mxu1 }
 0x1cb   : > { %v1053_v12 = vadd.f32 %v1049_v11, %v969_v9 }
 0x1cd   : > { %1055 = vst [vmem:[%s291_s16 + $0x8] sm:$0xff] %v1053_v12  ;;  %v1061_v20 = vmul.f32 %v1053_v12, %v1053_v12 }
 0x1cf   : > { %v945_v14 = vpop.f32.mrf.mxu2 }
 0x1d0   : > { %v968_v15 = vadd.f32 %v945_v14, %v884_v13 }
 0x1d1   : > { %v1029_v16 = vpop.f32.mrf.mxu0 }
 0x1d2   : > { %v1052_v17 = vadd.f32 %v1029_v16, %v968_v15 }
 0x1d4   : > { %1054 = vst [vmem:[%s291_s16] sm:$0xff] %v1052_v17  ;;  %v1056_v18 = vadd.f32 %v1053_v12, %v1052_v17  ;;  %v1060_v19 = vmul.f32 %v1052_v17, %v1052_v17 }
 0x1d6   : > { %1057 = vadd.xlane.f32.xlu1 %v1056_v18  ;;  %v1062_v21 = vadd.f32 %v1061_v20, %v1060_v19 }
 0x1d8   : > { %1063 = vadd.xlane.f32.xlu2 %v1062_v21 }
 0x249   : > { %v1058_v22 = vpop.xlane.xlu1 %1057 }
 0x24a   : > { %1059 = vst.msk [vmem:[%s295_s17] sm:$0xff] %vm611_vm5, %v1058_v22 }
 0x24b   : > { %v1064_v23 = vpop.xlane.xlu2 %1063 }
 0x24c   : > { %1065 = vst.msk [vmem:[%s299_s20] sm:$0xff] %vm611_vm5, %v1064_v23 }
 0x24d PF: > { %s18_s24 = sadd.s32 1, %s1274_s24  }
 0x24e   : > { %p15_p4 = scmp.ge.s32.totalorder %s18_s24, 4  }
 0x250   :  { %17 = sbr.rel (!%p15_p4) target bundleno = 1 (0x1), region = 117 }

</bundles_post_ra>
